<compile_context>
chip_gen: v7x
topology: tpu7x:2x2x1
jax: 0.10.0
libtpu: 0.0.40
codegen_flags: <defaults>
</compile_context>

<pallas_src>
import functools
import numpy as np
import jax
import jax.numpy as jnp
from jax import lax
from jax.experimental import pallas as pl
from jax.experimental.pallas import tpu as pltpu

SQRT2 = float(np.sqrt(2.0))


def _round_up(x, m):
    return ((x + m - 1) // m) * m


# ---------------------------------------------------------------------------
# Pallas kernels: batched fused matmul  out[g] = act(a[g] @ w[g] + bias)
# ---------------------------------------------------------------------------
def _bmm_resident_kernel(a_ref, w_ref, b_ref, o_ref, *,
                         apply_act, gain, alpha, clamp):
    """Whole per-sample weight resident in VMEM; one dot per (g, m-tile)."""
    y = jnp.dot(a_ref[0], w_ref[0], preferred_element_type=jnp.float32)
    y = y + b_ref[...]                                   # f32 epilogue
    if apply_act:                                        # lrelu_agc
        y = jnp.where(y >= 0.0, y, alpha * y) * gain
        y = jnp.clip(y, -clamp, clamp)
    o_ref[0] = y.astype(o_ref.dtype)


def _bmm_tiled_kernel(a_ref, w_ref, b_ref, o_ref, acc_ref, *,
                      apply_act, gain, alpha, clamp):
    """Fallback: 4-D grid (G, M, N, K) with f32 VMEM accumulator."""
    @pl.when(pl.program_id(3) == 0)
    def _init():
        acc_ref[...] = jnp.zeros_like(acc_ref)

    acc_ref[...] += jnp.dot(a_ref[0], w_ref[0],
                            preferred_element_type=jnp.float32)

    @pl.when(pl.program_id(3) == pl.num_programs(3) - 1)
    def _epilogue():
        y = acc_ref[...] + b_ref[...]
        if apply_act:
            y = jnp.where(y >= 0.0, y, alpha * y) * gain
            y = jnp.clip(y, -clamp, clamp)
        o_ref[0] = y.astype(o_ref.dtype)


def bmm_bias_act(a, w, bias, *, apply_act, out_dtype=jnp.bfloat16,
                 gain=SQRT2, alpha=0.2, clamp=256.0):
    """a:(G,M,K), w:(G,K,N), bias:(N,) -> (G,M,N) with fused bias + lrelu_agc.

    Operands are bf16 on the MXU with f32 accumulation.  M/N/K are padded so
    every block is (8,128)-aligned and the output store is lane-dense; padding
    is sliced off before returning.
    """
    G, M, K = a.shape
    G2, K2, N = w.shape
    assert G == G2 and K == K2

    tm = max(8, min(512, _round_up(M, 8)))
    Mp = _round_up(M, tm)
    Kp_min = _round_up(K, 128)
    Np_min = _round_up(N, 128)
    odt = jnp.dtype(out_dtype).itemsize

    # Weight-resident path if the whole per-sample weight (double-buffered) plus
    # activation / output blocks fit comfortably under the 48 MiB VMEM limit
    # (conservative so the same code is safe on v7x's 64 MiB VMEM).
    vmem_est = (2 * Kp_min * Np_min * 2        # w, double-buffered, bf16
                + 2 * tm * Kp_min * 2          # a block, double-buffered, bf16
                + 2 * tm * Np_min * odt        # out block, double-buffered
                + 2 * tm * Np_min * 4)         # f32 intermediate headroom
    resident = vmem_est <= 36 * 1024 * 1024

    if resident:
        tk, tn = Kp_min, Np_min
    else:
        tk = Kp_min if Kp_min <= 1536 else 512   # collapse K grid for K <= 1536
        tn = Np_min if Np_min <= 512 else 512
    Kp = _round_up(K, tk)
    Np = _round_up(N, tn)

    a_p = a.astype(jnp.bfloat16)
    if Mp != M or Kp != K:
        a_p = jnp.pad(a_p, ((0, 0), (0, Mp - M), (0, Kp - K)))
    w_p = w.astype(jnp.bfloat16)
    if Kp != K or Np != N:
        w_p = jnp.pad(w_p, ((0, 0), (0, Kp - K), (0, Np - N)))
    b_p = jnp.pad(bias.astype(jnp.float32), (0, Np - N)).reshape(1, Np)

    cost = pl.CostEstimate(
        flops=2 * G * Mp * Np * Kp,
        transcendentals=0,
        bytes_accessed=2 * G * (Mp * Kp + Kp * Np) + G * Mp * Np * odt + 4 * Np)

    if resident:
        kern = functools.partial(_bmm_resident_kernel, apply_act=apply_act,
                                 gain=gain, alpha=alpha, clamp=clamp)
        out = pl.pallas_call(
            kern,
            out_shape=jax.ShapeDtypeStruct((G, Mp, Np), out_dtype),
            grid=(G, Mp // tm),
            in_specs=[
                pl.BlockSpec((1, tm, Kp), lambda g, i: (g, i, 0)),
                pl.BlockSpec((1, Kp, Np), lambda g, i: (g, 0, 0)),  # resident per sample
                pl.BlockSpec((1, Np), lambda g, i: (0, 0)),
            ],
            out_specs=pl.BlockSpec((1, tm, Np), lambda g, i: (g, i, 0)),
            compiler_params=pltpu.CompilerParams(
                dimension_semantics=("parallel", "parallel"),
                vmem_limit_bytes=48 * 1024 * 1024),
            cost_estimate=cost,
        )(a_p, w_p, b_p)
    else:
        kern = functools.partial(_bmm_tiled_kernel, apply_act=apply_act,
                                 gain=gain, alpha=alpha, clamp=clamp)
        out = pl.pallas_call(
            kern,
            out_shape=jax.ShapeDtypeStruct((G, Mp, Np), out_dtype),
            grid=(G, Mp // tm, Np // tn, Kp // tk),
            in_specs=[
                pl.BlockSpec((1, tm, tk), lambda g, i, j, k: (g, i, k)),
                pl.BlockSpec((1, tk, tn), lambda g, i, j, k: (g, k, j)),
                pl.BlockSpec((1, tn), lambda g, i, j, k: (0, j)),
            ],
            out_specs=pl.BlockSpec((1, tm, tn), lambda g, i, j, k: (g, i, j)),
            scratch_shapes=[pltpu.VMEM((tm, tn), jnp.float32)],
            compiler_params=pltpu.CompilerParams(
                dimension_semantics=("parallel", "parallel", "parallel", "arbitrary"),
                vmem_limit_bytes=48 * 1024 * 1024),
            cost_estimate=cost,
        )(a_p, w_p, b_p)

    if Mp != M or Np != N:
        out = out[:, :M, :N]
    return out


# ---------------------------------------------------------------------------
# Small / glue layers (launch-bound: plain XLA, per performance review)
# ---------------------------------------------------------------------------
def lrelu_agc(x, *, alpha=0.2, gain=SQRT2, clamp=256.0):
    y = jnp.where(x >= 0.0, x, alpha * x) * gain
    return jnp.clip(y, -clamp, clamp)


def fc_layer(x, p, *, act):
    """StyleGAN2 FullyConnectedLayer: y = x @ (w.T / sqrt(in)) + b (+ lrelu_agc).
    M = batch (tiny) -> plain XLA matmul; Pallas would be padding/launch bound."""
    out_f, in_f = p['w'].shape
    y = x @ (p['w'].T * (1.0 / np.sqrt(in_f))) + p['b']
    return lrelu_agc(y) if act else y


def torgb_layer(x_nhwc, p, w_long):
    """torgb: 1x1 modulated conv, demodulate=False, linear. OC = rgb_n (=3), so
    this is pure memory traffic; keep it as a plain XLA einsum emitting NCHW f32."""
    B, H, W, IC = x_nhwc.shape
    styles = fc_layer(w_long, p['affine'], act=False) * (1.0 / np.sqrt(IC))   # (B, IC)
    w = p['w'][:, :, 0, 0]                                                     # (OC, IC)
    y = jnp.einsum('bhwi,oi,bi->bohw', x_nhwc.astype(jnp.float32), w, styles,
                   preferred_element_type=jnp.float32)
    return y + p['b'][None, :, None, None]


def fir_upsample2x_nchw(x, g1d):
    """upfirdn2d.upsample2d(img, [1,3,3,1]): zero-insert x2 + 4-tap FIR, gain=4.
    Runs in NCHW so W (not C=3) sits on the lane dimension."""
    B, C, H, W = x.shape
    g0, g1, g2, g3 = g1d[0], g1d[1], g1d[2], g1d[3]
    # along H (axis=2)
    xl = jnp.concatenate([jnp.zeros_like(x[:, :, :1]), x[:, :, :-1]], axis=2)
    xr = jnp.concatenate([x[:, :, 1:], jnp.zeros_like(x[:, :, :1])], axis=2)
    even = g3 * xl + g1 * x
    odd = g2 * x + g0 * xr
    y = jnp.stack([even, odd], axis=3).reshape(B, C, 2 * H, W)
    # along W (axis=3)
    yl = jnp.concatenate([jnp.zeros_like(y[:, :, :, :1]), y[:, :, :, :-1]], axis=3)
    yr = jnp.concatenate([y[:, :, :, 1:], jnp.zeros_like(y[:, :, :, :1])], axis=3)
    even = g3 * yl + g1 * y
    odd = g2 * y + g0 * yr
    return jnp.stack([even, odd], axis=4).reshape(B, C, 2 * H, 2 * W)


# ---------------------------------------------------------------------------
# Modulated convolutions (routed through the Pallas GEMM)
# ---------------------------------------------------------------------------
def _im2col3x3(x_nhwc_bf16):
    """3x3 / stride-1 / SAME patches -> (B, H*W, 9*C) in bf16, column order (ky,kx,c)."""
    # TODO(synk): replace im2col glue with an implicit-GEMM Pallas kernel
    # (halo-tiled activation + 9 shifted dots into the acc scratch) to remove
    # the remaining 9x HBM expansion.
    B, H, W, C = x_nhwc_bf16.shape
    xp = jnp.pad(x_nhwc_bf16, ((0, 0), (1, 1), (1, 1), (0, 0)))
    cols = [xp[:, dy:dy + H, dx:dx + W, :] for dy in range(3) for dx in range(3)]
    cols = jnp.stack(cols, axis=3)                               # (B,H,W,9,C) bf16
    return cols.reshape(B, H * W, 9 * C)


def modconv3x3(x_nhwc, p, w_long):
    """Modulated 3x3 conv (demodulate=True, fused_modconv) + bias + lrelu_agc."""
    B, H, W, IC = x_nhwc.shape
    OC = p['w'].shape[0]
    styles = fc_layer(w_long, p['affine'], act=False)            # (B, IC)
    w = p['w']                                                   # (OC, IC, 3, 3)
    wsq = jnp.sum(jnp.square(w), axis=(2, 3))                    # (OC, IC)
    dcoef = lax.rsqrt(jnp.square(styles) @ wsq.T + 1e-8)         # (B, OC)
    wk = jnp.transpose(w, (2, 3, 1, 0))                          # (ky,kx,IC,OC)
    wmod = (wk[None] * styles[:, None, None, :, None]
            * dcoef[:, None, None, None, :])                     # (B,3,3,IC,OC)
    wmat = wmod.reshape(B, 9 * IC, OC)
    cols = _im2col3x3(x_nhwc.astype(jnp.bfloat16))               # bf16 (B,H*W,9*IC)
    # TODO(synk): noise injection omitted — noise_strength initializes to 0, so the
    # random/const noise term contributes exactly zero in this forward pass.
    out = bmm_bias_act(cols, wmat, p['b'], apply_act=True, out_dtype=jnp.bfloat16)
    return out.reshape(B, H, W, OC)


def modconv3x3_up2(x_nhwc, p, w_long, fir2d):
    """Modulated 3x3 conv with x2 upsample + FIR blur (conv2d_resample up=2),
    demodulation, bias and lrelu_agc — expressed as 4 sub-pixel phases of a
    stride-1 3x3 conv so the GEMM K stays 9*IC."""
    B, H, W, IC = x_nhwc.shape
    OC = p['w'].shape[0]
    styles = fc_layer(w_long, p['affine'], act=False)            # (B, IC)
    w = p['w']                                                   # (OC, IC, 3, 3)
    wsq = jnp.sum(jnp.square(w), axis=(2, 3))
    dcoef = lax.rsqrt(jnp.square(styles) @ wsq.T + 1e-8)         # (B, OC)

    # Compose the x2 FIR upsample (gain = up^2 = 4, filter applied flipped as in
    # upfirdn2d) with the 3x3 kernel into one effective 6x6 transposed kernel.
    we = jnp.zeros((OC, IC, 6, 6), jnp.float32)
    for uy in range(4):
        for ux in range(4):
            we = we.at[:, :, 3 - uy:6 - uy, 3 - ux:6 - ux].add(
                w * (4.0 * fir2d[3 - uy, 3 - ux]))

    # Sub-pixel (parity) decomposition: output phase (ry,rx) is a plain stride-1
    # 3x3 correlation of the low-res input with the phase kernel below.
    phase_k = []
    for ry in range(2):
        for rx in range(2):
            phase_k.append(we[:, :, ry::2, rx::2][:, :, ::-1, ::-1])   # (OC,IC,3,3)
    wp = jnp.stack(phase_k, axis=0)                              # (4,OC,IC,3,3)
    wp = jnp.transpose(wp, (3, 4, 2, 0, 1))                      # (ky,kx,IC,4,OC)
    wmod = (wp[None] * styles[:, None, None, :, None, None]
            * dcoef[:, None, None, None, None, :])               # (B,3,3,IC,4,OC)
    wmat = wmod.reshape(B, 9 * IC, 4 * OC)
    bias4 = jnp.tile(p['b'], 4)                                  # column order (phase, oc)

    cols = _im2col3x3(x_nhwc.astype(jnp.bfloat16))
    out = bmm_bias_act(cols, wmat, bias4, apply_act=True, out_dtype=jnp.bfloat16)
    # TODO(synk): fuse this bf16 sub-pixel shuffle into the kernel's output store
    # (strided out_spec) to remove one full-resolution HBM pass per block.
    out = out.reshape(B, H, W, 2, 2, OC)                         # (b, by, bx, ry, rx, oc)
    out = jnp.transpose(out, (0, 1, 3, 2, 4, 5)).reshape(B, 2 * H, 2 * W, OC)
    return out


# ---------------------------------------------------------------------------
# Parameter init (StyleGAN2-style: weights ~ N(0,1), biases 0, affine bias 1)
# ---------------------------------------------------------------------------
def init_synthesis_params(key, *, w_dim, w0_dim, resolution, rgb_n, ch_base, ch_max):
    log2res = int(np.log2(resolution))
    assert 2 ** log2res == resolution
    block_res = [2 ** i for i in range(2, log2res + 1)]
    keys = iter(jax.random.split(key, 128))
    randn = lambda shape: jax.random.normal(next(keys), shape, jnp.float32)
    wl_dim = w_dim + w0_dim
    ch = lambda r: min(ch_base // r, ch_max)

    def fc_p(i_n, o_n, bias_init=0.0):
        return {'w': randn((o_n, i_n)),
                'b': jnp.full((o_n,), bias_init, jnp.float32)}

    def conv_p(ic, oc, k=3):
        return {'affine': fc_p(wl_dim, ic, bias_init=1.0),
                'w': randn((oc, ic, k, k)),
                'b': jnp.zeros((oc,), jnp.float32),
                'noise_strength': jnp.zeros((), jnp.float32)}

    def torgb_p(ic):
        return {'affine': fc_p(wl_dim, ic, bias_init=1.0),
                'w': randn((rgb_n, ic, 1, 1)),
                'b': jnp.zeros((rgb_n,), jnp.float32)}

    c4 = ch(4)
    params = {
        'b4': {'fc': fc_p(w0_dim, c4 * 4 * 4),
               'conv': conv_p(c4, c4),
               'torgb': torgb_p(c4)},
        'blocks': [],
    }
    for resi, resj in zip(block_res[:-1], block_res[1:]):
        ci, cj = ch(resi), ch(resj)
        params['blocks'].append({'conv0': conv_p(ci, cj),
                                 'conv1': conv_p(cj, cj),
                                 'torgb': torgb_p(cj)})
    return params, block_res


# ---------------------------------------------------------------------------
# Synthesis forward (mirrors Synthesis.forward(x, feats, ws) -> img)
# ---------------------------------------------------------------------------
def _b4_forward(pb4, x_w0, feat4_nchw, ws_blk):
    B = x_w0.shape[0]
    c4 = pb4['conv']['w'].shape[0]
    h = fc_layer(x_w0, pb4['fc'], act=True)                          # (B, c4*16) f32
    xh = h.reshape(B, c4, 4, 4) + feat4_nchw                         # torch .view + add (NCHW)
    x_nhwc = jnp.transpose(xh, (0, 2, 3, 1))
    w_long = jnp.concatenate([ws_blk[:, 0], x_w0], axis=1)
    x_nhwc = modconv3x3(x_nhwc, pb4['conv'], w_long)
    w_long = jnp.concatenate([ws_blk[:, 1], x_w0], axis=1)
    img = torgb_layer(x_nhwc, pb4['torgb'], w_long)                  # f32 NCHW
    return x_nhwc, img


def _block_forward(pblk, x_nhwc, feat_nchw, img_nchw, ws_blk, w0, fir2d, g1d):
    w_long = jnp.concatenate([ws_blk[:, 0], w0], axis=1)
    x_nhwc = modconv3x3_up2(x_nhwc, pblk['conv0'], w_long, fir2d)
    x_nhwc = x_nhwc.astype(jnp.float32) + jnp.transpose(feat_nchw, (0, 2, 3, 1))
    w_long = jnp.concatenate([ws_blk[:, 1], w0], axis=1)
    x_nhwc = modconv3x3(x_nhwc, pblk['conv1'], w_long)
    img_nchw = fir_upsample2x_nchw(img_nchw, g1d)
    w_long = jnp.concatenate([ws_blk[:, 2], w0], axis=1)
    img_nchw = img_nchw + torgb_layer(x_nhwc, pblk['torgb'], w_long)
    return x_nhwc, img_nchw


def synthesis_forward(params, x, feats, ws, fir1d, *, block_res):
    """x:(B,w0_dim), feats: tuple ordered by block_res (NCHW), ws:(B,num_ws,w_dim).
    Returns img (B, rgb_n, resolution, resolution) float32 NCHW."""
    fir2d = jnp.outer(fir1d, fir1d)
    fir2d = fir2d / jnp.sum(fir2d)
    g1d = 2.0 * fir1d / jnp.sum(fir1d)          # per-axis upsample taps (total gain 4)

    # split ws exactly like Synthesis.forward (torgb's w shared with next block)
    block_ws = []
    w_idx = 0
    for res in block_res:
        n = 2 if res == 4 else 3
        block_ws.append(ws[:, w_idx:w_idx + n])
        w_idx += 1 if res == 4 else 2

    w0 = x
    xh, img = _b4_forward(params['b4'], x, feats[0], block_ws[0])
    for pblk, feat, cur_ws in zip(params['blocks'], feats[1:], block_ws[1:]):
        xh, img = _block_forward(pblk, xh, feat, img, cur_ws, w0, fir2d, g1d)
    return img.astype(jnp.float32)


if __name__ == "__main__":
    # small config: resolution=16 -> block_res [4, 8, 16]; channels 32/16/8; num_ws=6
    w_dim, w0_dim, resolution, rgb_n = 32, 64, 16, 3
    ch_base, ch_max = 128, 32
    batch = 2

    key = jax.random.PRNGKey(0)
    kp, kx, kw, kf = jax.random.split(key, 4)
    params, block_res = init_synthesis_params(
        kp, w_dim=w_dim, w0_dim=w0_dim, resolution=resolution,
        rgb_n=rgb_n, ch_base=ch_base, ch_max=ch_max)

    ch = lambda r: min(ch_base // r, ch_max)
    num_ws = 2 + 2 * (len(block_res) - 1)

    x = jax.random.normal(kx, (batch, w0_dim), jnp.float32)          # comod / bottleneck vector
    ws = jax.random.normal(kw, (batch, num_ws, w_dim), jnp.float32)
    fkeys = jax.random.split(kf, len(block_res))
    feats = tuple(jax.random.normal(k, (batch, ch(r), r, r), jnp.float32)
                  for k, r in zip(fkeys, block_res))                 # encoder skips (NCHW)
    fir1d = jnp.array([1.0, 3.0, 3.0, 1.0], jnp.float32)

    fwd = jax.jit(functools.partial(synthesis_forward, block_res=tuple(block_res)))
    img = fwd(params, x, feats, ws, fir1d)
    img = jax.block_until_ready(img)

    assert img.shape == (batch, rgb_n, resolution, resolution)
    assert bool(jnp.all(jnp.isfinite(img)))
    print("KERNEL_OK")
</pallas_src>

<mosaic_0001>
module attributes {stable_mosaic.version = 11 : i64} {
  func.func @_bmm_resident_kernel(%arg0: i32, %arg1: i32, %arg2: memref<1x16x384xbf16, #tpu.memory_space<vmem>>, %arg3: memref<1x384x128xbf16, #tpu.memory_space<vmem>>, %arg4: memref<1x128xf32, #tpu.memory_space<vmem>>, %arg5: memref<1x16x128xbf16, #tpu.memory_space<vmem>>) attributes {dimension_semantics = [#tpu.dimension_semantics<parallel>, #tpu.dimension_semantics<parallel>], iteration_bounds = array<i64: 2, 1>, scalar_prefetch = 0 : i64, scratch_operands = 0 : i64, tpu.core_type = #tpu.core_type<tc>, window_params = [{transform_indices = @transform_0, window_bounds = array<i64: 1, 16, 384>}, {transform_indices = @transform_1, window_bounds = array<i64: 1, 384, 128>}, {pipeline_mode = #tpu.pipeline_mode<synchronous>, transform_indices = @transform_2, window_bounds = array<i64: 1, 128>}, {transform_indices = @transform_3, window_bounds = array<i64: 1, 16, 128>}]} {
    %c0 = arith.constant 0 : index
    %c0_0 = arith.constant 0 : index
    %c0_1 = arith.constant 0 : index
    %0 = vector.load %arg2[%c0, %c0_0, %c0_1] : memref<1x16x384xbf16, #tpu.memory_space<vmem>>, vector<1x16x384xbf16>
    %1 = vector.shape_cast %0 : vector<1x16x384xbf16> to vector<16x384xbf16>
    %c0_2 = arith.constant 0 : index
    %c0_3 = arith.constant 0 : index
    %c0_4 = arith.constant 0 : index
    %2 = vector.load %arg3[%c0_2, %c0_3, %c0_4] : memref<1x384x128xbf16, #tpu.memory_space<vmem>>, vector<1x384x128xbf16>
    %3 = vector.shape_cast %2 : vector<1x384x128xbf16> to vector<384x128xbf16>
    %cst = arith.constant dense<0.000000e+00> : vector<16x128xf32>
    %4 = tpu.matmul %1, %3, %cst {dimension_numbers = #tpu.dot_dimension_numbers<[1], [0], [0], [1], [0, 0, 1, 1], [], []>} : vector<16x384xbf16>, vector<384x128xbf16>, vector<16x128xf32> -> vector<16x128xf32>
    %c0_5 = arith.constant 0 : index
    %c0_6 = arith.constant 0 : index
    %5 = vector.load %arg4[%c0_5, %c0_6] : memref<1x128xf32, #tpu.memory_space<vmem>>, vector<1x128xf32>
    %6 = vector.broadcast %5 : vector<1x128xf32> to vector<16x128xf32>
    %7 = arith.addf %4, %6 : vector<16x128xf32>
    %cst_7 = arith.constant 0.000000e+00 : f32
    %8 = vector.broadcast %cst_7 : f32 to vector<16x128xf32>
    %9 = arith.cmpf oge, %7, %8 : vector<16x128xf32>
    %cst_8 = arith.constant 2.000000e-01 : f32
    %10 = vector.broadcast %cst_8 : f32 to vector<16x128xf32>
    %11 = arith.mulf %10, %7 : vector<16x128xf32>
    %12 = arith.select %9, %7, %11 : vector<16x128xi1>, vector<16x128xf32>
    %cst_9 = arith.constant 1.41421354 : f32
    %13 = vector.broadcast %cst_9 : f32 to vector<16x128xf32>
    %14 = arith.mulf %12, %13 : vector<16x128xf32>
    %cst_10 = arith.constant -2.560000e+02 : f32
    %cst_11 = arith.constant 2.560000e+02 : f32
    %15 = vector.broadcast %cst_10 : f32 to vector<16x128xf32>
    %16 = arith.maximumf %15, %14 : vector<16x128xf32>
    %17 = vector.broadcast %cst_11 : f32 to vector<16x128xf32>
    %18 = arith.minimumf %17, %16 : vector<16x128xf32>
    %19 = arith.truncf %18 : vector<16x128xf32> to vector<16x128xbf16>
    %c0_12 = arith.constant 0 : index
    %c0_13 = arith.constant 0 : index
    %c0_14 = arith.constant 0 : index
    %20 = vector.load %arg5[%c0_12, %c0_13, %c0_14] : memref<1x16x128xbf16, #tpu.memory_space<vmem>>, vector<1x16x128xbf16>
    %21 = vector.shape_cast %20 : vector<1x16x128xbf16> to vector<16x128xbf16>
    %22 = vector.shape_cast %19 : vector<16x128xbf16> to vector<1x16x128xbf16>
    tpu.vector_store %arg5[%c0_12, %c0_13, %c0_14], %22 {strides = array<i32>} : memref<1x16x128xbf16, #tpu.memory_space<vmem>>, vector<1x16x128xbf16>,
    return
  }
  func.func @transform_0(%arg0: i32, %arg1: i32) -> (i32, i32, i32) {
    %c0_i32 = arith.constant 0 : i32
    %c0_i32_0 = arith.constant 0 : i32
    return %arg0, %arg1, %c0_i32 : i32, i32, i32
  }
  func.func @transform_1(%arg0: i32, %arg1: i32) -> (i32, i32, i32) {
    %c0_i32 = arith.constant 0 : i32
    %c0_i32_0 = arith.constant 0 : i32
    %c0_i32_1 = arith.constant 0 : i32
    return %arg0, %c0_i32, %c0_i32_0 : i32, i32, i32
  }
  func.func @transform_2(%arg0: i32, %arg1: i32) -> (i32, i32) {
    %c0_i32 = arith.constant 0 : i32
    %c0_i32_0 = arith.constant 0 : i32
    %c0_i32_1 = arith.constant 0 : i32
    return %c0_i32, %c0_i32_0 : i32, i32
  }
  func.func @transform_3(%arg0: i32, %arg1: i32) -> (i32, i32, i32) {
    %c0_i32 = arith.constant 0 : i32
    %c0_i32_0 = arith.constant 0 : i32
    return %arg0, %arg1, %c0_i32 : i32, i32, i32
  }
}

module attributes {stable_mosaic.version = 11 : i64} {
  func.func @_bmm_resident_kernel(%arg0: i32, %arg1: i32, %arg2: memref<1x64x256xbf16, #tpu.memory_space<vmem>>, %arg3: memref<1x256x128xbf16, #tpu.memory_space<vmem>>, %arg4: memref<1x128xf32, #tpu.memory_space<vmem>>, %arg5: memref<1x64x128xbf16, #tpu.memory_space<vmem>>) attributes {dimension_semantics = [#tpu.dimension_semantics<parallel>, #tpu.dimension_semantics<parallel>], iteration_bounds = array<i64: 2, 1>, scalar_prefetch = 0 : i64, scratch_operands = 0 : i64, tpu.core_type = #tpu.core_type<tc>, window_params = [{transform_indices = @transform_0, window_bounds = array<i64: 1, 64, 256>}, {transform_indices = @transform_1, window_bounds = array<i64: 1, 256, 128>}, {pipeline_mode = #tpu.pipeline_mode<synchronous>, transform_indices = @transform_2, window_bounds = array<i64: 1, 128>}, {transform_indices = @transform_3, window_bounds = array<i64: 1, 64, 128>}]} {
    %c0 = arith.constant 0 : index
    %c0_0 = arith.constant 0 : index
    %c0_1 = arith.constant 0 : index
    %0 = vector.load %arg2[%c0, %c0_0, %c0_1] : memref<1x64x256xbf16, #tpu.memory_space<vmem>>, vector<1x64x256xbf16>
    %1 = vector.shape_cast %0 : vector<1x64x256xbf16> to vector<64x256xbf16>
    %c0_2 = arith.constant 0 : index
    %c0_3 = arith.constant 0 : index
    %c0_4 = arith.constant 0 : index
    %2 = vector.load %arg3[%c0_2, %c0_3, %c0_4] : memref<1x256x128xbf16, #tpu.memory_space<vmem>>, vector<1x256x128xbf16>
    %3 = vector.shape_cast %2 : vector<1x256x128xbf16> to vector<256x128xbf16>
    %cst = arith.constant dense<0.000000e+00> : vector<64x128xf32>
    %4 = tpu.matmul %1, %3, %cst {dimension_numbers = #tpu.dot_dimension_numbers<[1], [0], [0], [1], [0, 0, 1, 1], [], []>} : vector<64x256xbf16>, vector<256x128xbf16>, vector<64x128xf32> -> vector<64x128xf32>
    %c0_5 = arith.constant 0 : index
    %c0_6 = arith.constant 0 : index
    %5 = vector.load %arg4[%c0_5, %c0_6] : memref<1x128xf32, #tpu.memory_space<vmem>>, vector<1x128xf32>
    %6 = vector.broadcast %5 : vector<1x128xf32> to vector<64x128xf32>
    %7 = arith.addf %4, %6 : vector<64x128xf32>
    %cst_7 = arith.constant 0.000000e+00 : f32
    %8 = vector.broadcast %cst_7 : f32 to vector<64x128xf32>
    %9 = arith.cmpf oge, %7, %8 : vector<64x128xf32>
    %cst_8 = arith.constant 2.000000e-01 : f32
    %10 = vector.broadcast %cst_8 : f32 to vector<64x128xf32>
    %11 = arith.mulf %10, %7 : vector<64x128xf32>
    %12 = arith.select %9, %7, %11 : vector<64x128xi1>, vector<64x128xf32>
    %cst_9 = arith.constant 1.41421354 : f32
    %13 = vector.broadcast %cst_9 : f32 to vector<64x128xf32>
    %14 = arith.mulf %12, %13 : vector<64x128xf32>
    %cst_10 = arith.constant -2.560000e+02 : f32
    %cst_11 = arith.constant 2.560000e+02 : f32
    %15 = vector.broadcast %cst_10 : f32 to vector<64x128xf32>
    %16 = arith.maximumf %15, %14 : vector<64x128xf32>
    %17 = vector.broadcast %cst_11 : f32 to vector<64x128xf32>
    %18 = arith.minimumf %17, %16 : vector<64x128xf32>
    %19 = arith.truncf %18 : vector<64x128xf32> to vector<64x128xbf16>
    %c0_12 = arith.constant 0 : index
    %c0_13 = arith.constant 0 : index
    %c0_14 = arith.constant 0 : index
    %20 = vector.load %arg5[%c0_12, %c0_13, %c0_14] : memref<1x64x128xbf16, #tpu.memory_space<vmem>>, vector<1x64x128xbf16>
    %21 = vector.shape_cast %20 : vector<1x64x128xbf16> to vector<64x128xbf16>
    %22 = vector.shape_cast %19 : vector<64x128xbf16> to vector<1x64x128xbf16>
    tpu.vector_store %arg5[%c0_12, %c0_13, %c0_14], %22 {strides = array<i32>} : memref<1x64x128xbf16, #tpu.memory_space<vmem>>, vector<1x64x128xbf16>,
    return
  }
  func.func @transform_0(%arg0: i32, %arg1: i32) -> (i32, i32, i32) {
    %c0_i32 = arith.constant 0 : i32
    %c0_i32_0 = arith.constant 0 : i32
    return %arg0, %arg1, %c0_i32 : i32, i32, i32
  }
  func.func @transform_1(%arg0: i32, %arg1: i32) -> (i32, i32, i32) {
    %c0_i32 = arith.constant 0 : i32
    %c0_i32_0 = arith.constant 0 : i32
    %c0_i32_1 = arith.constant 0 : i32
    return %arg0, %c0_i32, %c0_i32_0 : i32, i32, i32
  }
  func.func @transform_2(%arg0: i32, %arg1: i32) -> (i32, i32) {
    %c0_i32 = arith.constant 0 : i32
    %c0_i32_0 = arith.constant 0 : i32
    %c0_i32_1 = arith.constant 0 : i32
    return %c0_i32, %c0_i32_0 : i32, i32
  }
  func.func @transform_3(%arg0: i32, %arg1: i32) -> (i32, i32, i32) {
    %c0_i32 = arith.constant 0 : i32
    %c0_i32_0 = arith.constant 0 : i32
    return %arg0, %arg1, %c0_i32 : i32, i32, i32
  }
}

module attributes {stable_mosaic.version = 11 : i64} {
  func.func @_bmm_resident_kernel(%arg0: i32, %arg1: i32, %arg2: memref<1x64x256xbf16, #tpu.memory_space<vmem>>, %arg3: memref<1x256x128xbf16, #tpu.memory_space<vmem>>, %arg4: memref<1x128xf32, #tpu.memory_space<vmem>>, %arg5: memref<1x64x128xbf16, #tpu.memory_space<vmem>>) attributes {dimension_semantics = [#tpu.dimension_semantics<parallel>, #tpu.dimension_semantics<parallel>], iteration_bounds = array<i64: 2, 1>, scalar_prefetch = 0 : i64, scratch_operands = 0 : i64, tpu.core_type = #tpu.core_type<tc>, window_params = [{transform_indices = @transform_0, window_bounds = array<i64: 1, 64, 256>}, {transform_indices = @transform_1, window_bounds = array<i64: 1, 256, 128>}, {pipeline_mode = #tpu.pipeline_mode<synchronous>, transform_indices = @transform_2, window_bounds = array<i64: 1, 128>}, {transform_indices = @transform_3, window_bounds = array<i64: 1, 64, 128>}]} {
    %c0 = arith.constant 0 : index
    %c0_0 = arith.constant 0 : index
    %c0_1 = arith.constant 0 : index
    %0 = vector.load %arg2[%c0, %c0_0, %c0_1] : memref<1x64x256xbf16, #tpu.memory_space<vmem>>, vector<1x64x256xbf16>
    %1 = vector.shape_cast %0 : vector<1x64x256xbf16> to vector<64x256xbf16>
    %c0_2 = arith.constant 0 : index
    %c0_3 = arith.constant 0 : index
    %c0_4 = arith.constant 0 : index
    %2 = vector.load %arg3[%c0_2, %c0_3, %c0_4] : memref<1x256x128xbf16, #tpu.memory_space<vmem>>, vector<1x256x128xbf16>
    %3 = vector.shape_cast %2 : vector<1x256x128xbf16> to vector<256x128xbf16>
    %cst = arith.constant dense<0.000000e+00> : vector<64x128xf32>
    %4 = tpu.matmul %1, %3, %cst {dimension_numbers = #tpu.dot_dimension_numbers<[1], [0], [0], [1], [0, 0, 1, 1], [], []>} : vector<64x256xbf16>, vector<256x128xbf16>, vector<64x128xf32> -> vector<64x128xf32>
    %c0_5 = arith.constant 0 : index
    %c0_6 = arith.constant 0 : index
    %5 = vector.load %arg4[%c0_5, %c0_6] : memref<1x128xf32, #tpu.memory_space<vmem>>, vector<1x128xf32>
    %6 = vector.broadcast %5 : vector<1x128xf32> to vector<64x128xf32>
    %7 = arith.addf %4, %6 : vector<64x128xf32>
    %cst_7 = arith.constant 0.000000e+00 : f32
    %8 = vector.broadcast %cst_7 : f32 to vector<64x128xf32>
    %9 = arith.cmpf oge, %7, %8 : vector<64x128xf32>
    %cst_8 = arith.constant 2.000000e-01 : f32
    %10 = vector.broadcast %cst_8 : f32 to vector<64x128xf32>
    %11 = arith.mulf %10, %7 : vector<64x128xf32>
    %12 = arith.select %9, %7, %11 : vector<64x128xi1>, vector<64x128xf32>
    %cst_9 = arith.constant 1.41421354 : f32
    %13 = vector.broadcast %cst_9 : f32 to vector<64x128xf32>
    %14 = arith.mulf %12, %13 : vector<64x128xf32>
    %cst_10 = arith.constant -2.560000e+02 : f32
    %cst_11 = arith.constant 2.560000e+02 : f32
    %15 = vector.broadcast %cst_10 : f32 to vector<64x128xf32>
    %16 = arith.maximumf %15, %14 : vector<64x128xf32>
    %17 = vector.broadcast %cst_11 : f32 to vector<64x128xf32>
    %18 = arith.minimumf %17, %16 : vector<64x128xf32>
    %19 = arith.truncf %18 : vector<64x128xf32> to vector<64x128xbf16>
    %c0_12 = arith.constant 0 : index
    %c0_13 = arith.constant 0 : index
    %c0_14 = arith.constant 0 : index
    %20 = vector.load %arg5[%c0_12, %c0_13, %c0_14] : memref<1x64x128xbf16, #tpu.memory_space<vmem>>, vector<1x64x128xbf16>
    %21 = vector.shape_cast %20 : vector<1x64x128xbf16> to vector<64x128xbf16>
    %22 = vector.shape_cast %19 : vector<64x128xbf16> to vector<1x64x128xbf16>
    tpu.vector_store %arg5[%c0_12, %c0_13, %c0_14], %22 {strides = array<i32>} : memref<1x64x128xbf16, #tpu.memory_space<vmem>>, vector<1x64x128xbf16>,
    return
  }
  func.func @transform_0(%arg0: i32, %arg1: i32) -> (i32, i32, i32) {
    %c0_i32 = arith.constant 0 : i32
    %c0_i32_0 = arith.constant 0 : i32
    return %arg0, %arg1, %c0_i32 : i32, i32, i32
  }
  func.func @transform_1(%arg0: i32, %arg1: i32) -> (i32, i32, i32) {
    %c0_i32 = arith.constant 0 : i32
    %c0_i32_0 = arith.constant 0 : i32
    %c0_i32_1 = arith.constant 0 : i32
    return %arg0, %c0_i32, %c0_i32_0 : i32, i32, i32
  }
  func.func @transform_2(%arg0: i32, %arg1: i32) -> (i32, i32) {
    %c0_i32 = arith.constant 0 : i32
    %c0_i32_0 = arith.constant 0 : i32
    %c0_i32_1 = arith.constant 0 : i32
    return %c0_i32, %c0_i32_0 : i32, i32
  }
  func.func @transform_3(%arg0: i32, %arg1: i32) -> (i32, i32, i32) {
    %c0_i32 = arith.constant 0 : i32
    %c0_i32_0 = arith.constant 0 : i32
    return %arg0, %arg1, %c0_i32 : i32, i32, i32
  }
}

module attributes {stable_mosaic.version = 11 : i64} {
  func.func @_bmm_resident_kernel(%arg0: i32, %arg1: i32, %arg2: memref<1x256x128xbf16, #tpu.memory_space<vmem>>, %arg3: memref<1x128x128xbf16, #tpu.memory_space<vmem>>, %arg4: memref<1x128xf32, #tpu.memory_space<vmem>>, %arg5: memref<1x256x128xbf16, #tpu.memory_space<vmem>>) attributes {dimension_semantics = [#tpu.dimension_semantics<parallel>, #tpu.dimension_semantics<parallel>], iteration_bounds = array<i64: 2, 1>, scalar_prefetch = 0 : i64, scratch_operands = 0 : i64, tpu.core_type = #tpu.core_type<tc>, window_params = [{transform_indices = @transform_0, window_bounds = array<i64: 1, 256, 128>}, {transform_indices = @transform_1, window_bounds = array<i64: 1, 128, 128>}, {pipeline_mode = #tpu.pipeline_mode<synchronous>, transform_indices = @transform_2, window_bounds = array<i64: 1, 128>}, {transform_indices = @transform_3, window_bounds = array<i64: 1, 256, 128>}]} {
    %c0 = arith.constant 0 : index
    %c0_0 = arith.constant 0 : index
    %c0_1 = arith.constant 0 : index
    %0 = vector.load %arg2[%c0, %c0_0, %c0_1] : memref<1x256x128xbf16, #tpu.memory_space<vmem>>, vector<1x256x128xbf16>
    %1 = vector.shape_cast %0 : vector<1x256x128xbf16> to vector<256x128xbf16>
    %c0_2 = arith.constant 0 : index
    %c0_3 = arith.constant 0 : index
    %c0_4 = arith.constant 0 : index
    %2 = vector.load %arg3[%c0_2, %c0_3, %c0_4] : memref<1x128x128xbf16, #tpu.memory_space<vmem>>, vector<1x128x128xbf16>
    %3 = vector.shape_cast %2 : vector<1x128x128xbf16> to vector<128x128xbf16>
    %cst = arith.constant dense<0.000000e+00> : vector<256x128xf32>
    %4 = tpu.matmul %1, %3, %cst {dimension_numbers = #tpu.dot_dimension_numbers<[1], [0], [0], [1], [0, 0, 1, 1], [], []>} : vector<256x128xbf16>, vector<128x128xbf16>, vector<256x128xf32> -> vector<256x128xf32>
    %c0_5 = arith.constant 0 : index
    %c0_6 = arith.constant 0 : index
    %5 = vector.load %arg4[%c0_5, %c0_6] : memref<1x128xf32, #tpu.memory_space<vmem>>, vector<1x128xf32>
    %6 = vector.broadcast %5 : vector<1x128xf32> to vector<256x128xf32>
    %7 = arith.addf %4, %6 : vector<256x128xf32>
    %cst_7 = arith.constant 0.000000e+00 : f32
    %8 = vector.broadcast %cst_7 : f32 to vector<256x128xf32>
    %9 = arith.cmpf oge, %7, %8 : vector<256x128xf32>
    %cst_8 = arith.constant 2.000000e-01 : f32
    %10 = vector.broadcast %cst_8 : f32 to vector<256x128xf32>
    %11 = arith.mulf %10, %7 : vector<256x128xf32>
    %12 = arith.select %9, %7, %11 : vector<256x128xi1>, vector<256x128xf32>
    %cst_9 = arith.constant 1.41421354 : f32
    %13 = vector.broadcast %cst_9 : f32 to vector<256x128xf32>
    %14 = arith.mulf %12, %13 : vector<256x128xf32>
    %cst_10 = arith.constant -2.560000e+02 : f32
    %cst_11 = arith.constant 2.560000e+02 : f32
    %15 = vector.broadcast %cst_10 : f32 to vector<256x128xf32>
    %16 = arith.maximumf %15, %14 : vector<256x128xf32>
    %17 = vector.broadcast %cst_11 : f32 to vector<256x128xf32>
    %18 = arith.minimumf %17, %16 : vector<256x128xf32>
    %19 = arith.truncf %18 : vector<256x128xf32> to vector<256x128xbf16>
    %c0_12 = arith.constant 0 : index
    %c0_13 = arith.constant 0 : index
    %c0_14 = arith.constant 0 : index
    %20 = vector.load %arg5[%c0_12, %c0_13, %c0_14] : memref<1x256x128xbf16, #tpu.memory_space<vmem>>, vector<1x256x128xbf16>
    %21 = vector.shape_cast %20 : vector<1x256x128xbf16> to vector<256x128xbf16>
    %22 = vector.shape_cast %19 : vector<256x128xbf16> to vector<1x256x128xbf16>
    tpu.vector_store %arg5[%c0_12, %c0_13, %c0_14], %22 {strides = array<i32>} : memref<1x256x128xbf16, #tpu.memory_space<vmem>>, vector<1x256x128xbf16>,
    return
  }
  func.func @transform_0(%arg0: i32, %arg1: i32) -> (i32, i32, i32) {
    %c0_i32 = arith.constant 0 : i32
    %c0_i32_0 = arith.constant 0 : i32
    return %arg0, %arg1, %c0_i32 : i32, i32, i32
  }
  func.func @transform_1(%arg0: i32, %arg1: i32) -> (i32, i32, i32) {
    %c0_i32 = arith.constant 0 : i32
    %c0_i32_0 = arith.constant 0 : i32
    %c0_i32_1 = arith.constant 0 : i32
    return %arg0, %c0_i32, %c0_i32_0 : i32, i32, i32
  }
  func.func @transform_2(%arg0: i32, %arg1: i32) -> (i32, i32) {
    %c0_i32 = arith.constant 0 : i32
    %c0_i32_0 = arith.constant 0 : i32
    %c0_i32_1 = arith.constant 0 : i32
    return %c0_i32, %c0_i32_0 : i32, i32
  }
  func.func @transform_3(%arg0: i32, %arg1: i32) -> (i32, i32, i32) {
    %c0_i32 = arith.constant 0 : i32
    %c0_i32_0 = arith.constant 0 : i32
    return %arg0, %arg1, %c0_i32 : i32, i32, i32
  }
}

</mosaic_0001>

<bundles_post_ra>
// kernel: tile.13
= control target key start
LH: loop header
LB: loop body
LE: loop exit
PB: predicated region body
PF: predicated region fallthrough
CT: control target
= control target key end

     0   :  { %s22_s0 = inlined_call_operand.vmem [shape: f32[16], index: 0, kind: input, shape index: {}]   ;;  %s23_s1 = inlined_call_operand.vmem [shape: f32[4,16], index: 1, kind: output, shape index: {}]  }
   0x1   :  { %v4_v0 = vld [vmem:[%s22_s0] ss:$0 sm:$0xff] }
   0x2   :  { %5 = vst [vmem:[%s23_s1] sm:$0xf] %v4_v0 }

// kernel: tile.14
= control target key start
LH: loop header
LB: loop body
LE: loop exit
PB: predicated region body
PF: predicated region fallthrough
CT: control target
= control target key end

     0   :  { %vm7_vm0 = vcmask 130048   ;;  %s37_s8 = smov 16   ;;  %s38_s9 = smov 32   ;;  %vm13_vm1 = vcmask 523648   ;;  %vm19_vm2 = vcmask 392448   ;;  %vm25_vm3 = vcmask 261248   ;;  %s55_s0 = inlined_call_operand.vmem [shape: f32[4,16], index: 0, kind: input, shape index: {}]   ;;  %s56_s1 = inlined_call_operand.vmem [shape: f32[64], index: 1, kind: output, shape index: {}]  }
   0x1   :  { %v4_v0 = vld [vmem:[%s55_s0] sm:$0xf]  ;;  %s36_s0 = smov 48  }
   0x2   :  { %5 = vst [vmem:[#allocation1] sm:$0xf] %v4_v0 }
   0x9   :  { %v10_v1 = vld [vmem:[#allocation1 + $0x3] sm:$0x1]   ;;  %v22_v2 = vld [vmem:[#allocation1 + $0x1] sm:$0x1]   ;;  %v6_v3 = vld [vmem:[#allocation1] sm:$0x1]  }
   0xa   :  { %11 = vrot.lane.b32.xlu0 %v10_v1, %s36_s0  ;;  %23 = vrot.lane.b32.xlu1 %v22_v2, %s37_s8  ;;  %v16_v4 = vld [vmem:[#allocation1 + $0x2] sm:$0x1]   ;;  %8 = vst.msk [vmem:[#allocation0] sm:$0x1] %vm7_vm0, %v6_v3  }
   0xe   :  { %17 = vrot.lane.b32.xlu0 %v16_v4, %s38_s9 }
  0x7c   :  { %v12_v5 = vpop.permute.xlu0 %11   ;;  %v24_v6 = vpop.permute.xlu1 %23  }
  0x7d   :  { %14 = vst.msk [vmem:[#allocation0] sm:$0x1] %vm13_vm1, %v12_v5  }
  0x80   :  { %v18_v7 = vpop.permute.xlu0 %17  }
  0x81   :  { %20 = vst.msk [vmem:[#allocation0] sm:$0x1] %vm19_vm2, %v18_v7  }
  0x82   :  { %26 = vst.msk [vmem:[#allocation0] sm:$0x1] %vm25_vm3, %v24_v6  }
  0x89   :  { %v30_v8 = vld [vmem:[#allocation0] sm:$0x1] }
  0x8a   :  { %32 = vst [vmem:[%s56_s1] sm:$0x1] %v30_v8 }

// kernel: synthesis_forward.5
= control target key start
LH: loop header
LB: loop body
LE: loop exit
PB: predicated region body
PF: predicated region fallthrough
CT: control target
= control target key end

     0   :  { %s863_s12 = smov 0   ;;  %s865_s13 = smov 0   ;;  %s933_s0 = inlined_call_operand.vmem [shape: bf16[2,16,384], index: 0, kind: input, shape index: {}]   ;;  %s934_s1 = inlined_call_operand.vmem [shape: bf16[2,384,128], index: 1, kind: input, shape index: {}]   ;;  %s935_s2 = inlined_call_operand.vmem [shape: f32[1,128], index: 2, kind: input, shape index: {}]   ;;  %s936_s3 = inlined_call_operand.vmem [shape: bf16[2,16,128], index: 3, kind: output, shape index: {}]  }
   0x1   :  { %s867_s14 = smov 0  }
   0x2 LB: > { %s25_s15 = sadd.s32 1, %s835_s13  ;;  %p663_p0 = scmp.ge.s32.totalorder %s839_s14, 1  ;;  %s839_s14 = sphi %s867_s14, %s13_s14   ;;  %s835_s13 = sphi %s865_s13, %s938_s13   ;;  %s831_s12 = sphi %s863_s12, %s937_s12  }
   0x3   : > { %p27_p1 = scmp.ge.s32.totalorder %s25_s15, 2  ;;  %p169_p2 = scmp.lt.s32.totalorder %s839_s14, 3 }
   0x5   : > { %s940_s15 = smov (%p27_p1, %s25_s15), 0  ;;  %p170_p3 = pnand %p663_p0, %p169_p2 }
   0x6   : > { %p208_p4 = scmp.lt.s32.totalorder (!%p170_p3), %s831_s12, 1  ;;  %v841_v0 = vmov (!%p170_p3), 0.0   ;;  %vm842_vm0 = vmmov (!%p170_p3), 0   ;;  %v668_v30 = vld [vmem:[%s935_s2] ss:$0 sm:$0xff] (!%p170_p3) }
   0x7   : > { %173 = sbr.rel (%p170_p3) target bundleno = 282 (0x11a), region = 32  ;;  %741 = vmatprep.subr.bf16.mxu1 (!%p170_p3), %v841_v0  ;;  %757 = vmatprep.mubr.msk.bf16.mxu1 (!%p170_p3), %vm842_vm0, %v841_v0 }
   0xe   : > { %s942_s12 = smov (!%p208_p4, %s831_s12), 1 }
   0xf   : > { %s762_s16 = smul.u32 192, %s942_s12  ;;  %s702_s26 = sshll.u32 %s942_s12, 3 }
  0x10   : > { %s761_s20 = smul.u32 24, %s942_s12  ;;  %s231_s29 = scalar_lea.vmem %s936_s3, %s702_s26 }
  0x11   : > { %s887_s19 = scalar_lea.vmem %s934_s1, %s762_s16 }
  0x12   : > { %v789_v1 = vld [vmem:[%s887_s19 + $0x40] sm:$0xff]   ;;  %v792_v4 = vld [vmem:[%s887_s19 + $0x48] sm:$0xff]   ;;  %v795_v7 = vld [vmem:[%s887_s19 + $0x50] sm:$0xff]   ;;  %s216_s23 = scalar_lea.vmem %s933_s0, %s761_s20 }
  0x13   : > { %v790_v2 = vld [vmem:[%s887_s19] sm:$0xff]   ;;  %710 = vmatprep.subr.bf16.mxu0 %v789_v1  ;;  %v793_v5 = vld [vmem:[%s887_s19 + $0x8] sm:$0xff]   ;;  %v796_v8 = vld [vmem:[%s887_s19 + $0x10] sm:$0xff]  }
  0x14   : > { %v791_v3 = vld [vmem:[%s887_s19 + $0x80] sm:$0xff]   ;;  %711 = vmatpush3.bf16.msra.mxu0 %v790_v2  ;;  %v794_v6 = vld [vmem:[%s887_s19 + $0x88] sm:$0xff]   ;;  %v797_v9 = vld [vmem:[%s887_s19 + $0x90] sm:$0xff]  }
  0x15   : > { %742 = vmatpush3.bf16.msra.mxu1 %v791_v3  ;;  %712 = vmatprep.subr.bf16.mxu0 %v792_v4  ;;  %v798_v10 = vld [vmem:[%s887_s19 + $0x58] sm:$0xff]   ;;  %v801_v13 = vld [vmem:[%s887_s19 + $0x60] sm:$0xff]   ;;  %v804_v16 = vld [vmem:[%s887_s19 + $0x68] sm:$0xff]  }
  0x16   : > { %743 = vmatprep.subr.bf16.mxu1 %v841_v0  ;;  %v799_v11 = vld [vmem:[%s887_s19 + $0x18] sm:$0xff]   ;;  %v802_v14 = vld [vmem:[%s887_s19 + $0x20] sm:$0xff]   ;;  %v805_v17 = vld [vmem:[%s887_s19 + $0x28] sm:$0xff]  }
  0x17   : > { %v800_v12 = vld [vmem:[%s887_s19 + $0x98] sm:$0xff]   ;;  %v803_v15 = vld [vmem:[%s887_s19 + $0xa0] sm:$0xff]   ;;  %v806_v18 = vld [vmem:[%s887_s19 + $0xa8] sm:$0xff]  }
  0x18   : > { %713 = vmatpush3.bf16.msra.mxu0 %v793_v5  ;;  %v807_v19 = vld [vmem:[%s887_s19 + $0x70] sm:$0xff]   ;;  %v810_v22 = vld [vmem:[%s887_s19 + $0x78] sm:$0xff]   ;;  %v812_v26 = vld [vmem:[%s216_s23] ss:$12 sps:$4 sm:$0xff]  }
  0x19   : > { %744 = vmatpush3.bf16.msra.mxu1 %v794_v6  ;;  %714 = vmatprep.subr.bf16.mxu0 %v795_v7  ;;  %v808_v20 = vld [vmem:[%s887_s19 + $0x30] sm:$0xff]   ;;  %v811_v24 = vld [vmem:[%s887_s19 + $0x38] sm:$0xff]  }
  0x1a   : > { %745 = vmatprep.subr.bf16.mxu1 %v841_v0  ;;  %v809_v21 = vld [vmem:[%s887_s19 + $0xb0] sm:$0xff]   ;;  %v815_v25 = vld [vmem:[%s887_s19 + $0xb8] sm:$0xff]  }
  0x1b   : > { %v814_v23 = vld [vmem:[%s216_s23 + $0x4] ss:$12 sps:$4 sm:$0xff]   ;;  %v816_v27 = vld [vmem:[%s216_s23 + $0x8] ss:$12 sps:$4 sm:$0xff]  }
  0x1c   : > { %715 = vmatpush3.bf16.msra.mxu0 %v796_v8  ;;  %485 = vmatprep.mubr.bf16.mxu0 %v814_v23 }
  0x1d   : > { %746 = vmatpush3.bf16.msra.mxu1 %v797_v9  ;;  %716 = vmatprep.subr.bf16.mxu0 %v798_v10 }
  0x1e   : > { %747 = vmatprep.subr.bf16.mxu1 %v841_v0 }
  0x20   : > { %717 = vmatpush3.bf16.msra.mxu0 %v799_v11 }
  0x21   : > { %748 = vmatpush3.bf16.msra.mxu1 %v800_v12  ;;  %718 = vmatprep.subr.bf16.mxu0 %v801_v13 }
  0x22   : > { %749 = vmatprep.subr.bf16.mxu1 %v841_v0 }
  0x24   : > { %719 = vmatpush3.bf16.msra.mxu0 %v802_v14 }
  0x25   : > { %750 = vmatpush3.bf16.msra.mxu1 %v803_v15  ;;  %720 = vmatprep.subr.bf16.mxu0 %v804_v16 }
  0x26   : > { %751 = vmatprep.subr.bf16.mxu1 %v841_v0 }
  0x28   : > { %721 = vmatpush3.bf16.msra.mxu0 %v805_v17 }
  0x29   : > { %752 = vmatpush3.bf16.msra.mxu1 %v806_v18  ;;  %722 = vmatprep.subr.bf16.mxu0 %v807_v19 }
  0x2a   : > { %753 = vmatprep.subr.bf16.mxu1 %v841_v0 }
  0x2c   : > { %723 = vmatpush3.bf16.msra.mxu0 %v808_v20 }
  0x2d   : > { %754 = vmatpush3.bf16.msra.mxu1 %v809_v21  ;;  %724 = vmatprep.subr.bf16.mxu0 %v810_v22 }
  0x2e   : > { %755 = vmatprep.subr.bf16.mxu1 %v841_v0 }
  0x30   : > { %725 = vmatpush3.bf16.msra.mxu0 %v811_v24 }
  0x31   : > { %756 = vmatpush3.bf16.msra.mxu1 %v815_v25 }
  0x33   : > { %486 = vmatmul.mubr.bf16.vlgmr.msra.gmra.mrb[0].mxu0 %v812_v26 }
  0x34   : > { %758 = vmatmul.mubr.bf16.vlgmr.msra.gmra.mrb[0].mxu1 %v816_v27 }
 0x106   : > { %v726_v28 = vpop.f32.mrb[0].mxu0 }
 0x107   : > { %v727_v29 = vpop.f32.mrb[1].mxu0  ;;  %v528_v31 = vpop.f32.mrb[0].mxu1 }
 0x108   : > { %v728_v32 = vadd.f32 %v727_v29, %v726_v28  ;;  %v729_v33 = vpop.f32.mrb[2].mxu0  ;;  %v759_v34 = vpop.f32.mrb[1].mxu1 }
 0x109   : > { %v730_v35 = vpop.f32.mrb[3].mxu0  ;;  %v531_v36 = vpop.f32.mrb[2].mxu1 }
 0x10a   : > { %v488_v37 = vadd.f32 %v728_v32, %v668_v30  ;;  %v731_v38 = vadd.f32 %v730_v35, %v729_v33  ;;  %v760_v39 = vpop.f32.mrb[3].mxu1 }
 0x10c   : > { %v529_v40 = vadd.f32 %v528_v31, %v488_v37  ;;  %v491_v41 = vadd.f32 %v731_v38, %v668_v30 }
 0x10e   : > { %vm535_vm1 = vcmp.ge.f32.partialorder %v529_v40, 0.0  ;;  %v537_v42 = vmul.f32 0.2, %v529_v40  ;;  %v532_v43 = vadd.f32 %v531_v36, %v491_v41 }
 0x110   : > { %v539_v44 = vsel %vm535_vm1, %v529_v40, %v537_v42  ;;  %vm536_vm2 = vcmp.ge.f32.partialorder %v532_v43, 0.0  ;;  %v538_v45 = vmul.f32 0.2, %v532_v43 }
 0x111   : > { %v541_v46 = vmul.f32 1.4142135, %v539_v44 }
 0x112   : > { %v540_v47 = vsel %vm536_vm2, %v532_v43, %v538_v45 }
 0x113   : > { %v542_v48 = vmul.f32 1.4142135, %v540_v47  ;;  %v696_v49 = vclamps-f32 %v541_v46, 256.0 }
 0x115   : > { %v697_v50 = vclamps-f32 %v542_v48, 256.0 }
 0x117   : > { %v708_v51 = vpack.c.bf16 %v697_v50, %v696_v49 }
 0x119   : > { %709 = vst [vmem:[%s231_s29] sm:$0xff] %v708_v51  }
 0x11a PF: > { %s13_s14 = sadd.s32 1, %s839_s14   ;;  %s937_s12 = smov %s835_s13 }
 0x11b   : > { %p10_p5 = scmp.ge.s32.totalorder %s13_s14, 4   ;;  %s938_s13 = smov %s940_s15 }
 0x11d   :  { %12 = sbr.rel (!%p10_p5) target bundleno = 2 (0x2), region = 65 }

// kernel: synthesis_forward.7
= control target key start
LH: loop header
LB: loop body
LE: loop exit
PB: predicated region body
PF: predicated region fallthrough
CT: control target
= control target key end

     0   :  { %s841_s12 = smov 0   ;;  %s843_s13 = smov 0   ;;  %s913_s0 = inlined_call_operand.vmem [shape: bf16[2,64,256], index: 0, kind: input, shape index: {}]   ;;  %s914_s1 = inlined_call_operand.vmem [shape: bf16[2,256,128], index: 1, kind: input, shape index: {}]   ;;  %s915_s2 = inlined_call_operand.vmem [shape: f32[1,128], index: 2, kind: input, shape index: {}]   ;;  %s916_s3 = inlined_call_operand.vmem [shape: bf16[2,64,128], index: 3, kind: output, shape index: {}]  }
   0x1   :  { %s845_s14 = smov 0  }
   0x2 LB: > { %s25_s15 = sadd.s32 1, %s815_s13  ;;  %p644_p0 = scmp.ge.s32.totalorder %s819_s14, 1  ;;  %s819_s14 = sphi %s845_s14, %s13_s14   ;;  %s815_s13 = sphi %s843_s13, %s918_s13   ;;  %s811_s12 = sphi %s841_s12, %s917_s12  }
   0x3   : > { %p27_p1 = scmp.ge.s32.totalorder %s25_s15, 2  ;;  %p169_p2 = scmp.lt.s32.totalorder %s819_s14, 3 }
   0x5   : > { %s920_s15 = smov (%p27_p1, %s25_s15), 0  ;;  %p170_p3 = pnand %p644_p0, %p169_p2 }
   0x6   : > { %p208_p4 = scmp.lt.s32.totalorder (!%p170_p3), %s811_s12, 1  ;;  %v651_v26 = vld [vmem:[%s915_s2] ss:$0 sm:$0xff] (!%p170_p3) }
   0x7   : > { %173 = sbr.rel (%p170_p3) target bundleno = 290 (0x122), region = 32 }
   0xe   : > { %s922_s12 = smov (!%p208_p4, %s811_s12), 1 }
   0xf   : > { %s687_s16 = sshll.u32 %s922_s12, 7  ;;  %s686_s20 = sshll.u32 %s922_s12, 6 }
  0x10   : > { %s865_s19 = scalar_lea.vmem %s914_s1, %s687_s16  ;;  %s880_s23 = scalar_lea.vmem %s913_s0, %s686_s20 }
  0x11   : > { %v769_v0 = vld [vmem:[%s865_s19 + $0x40] sm:$0xff]   ;;  %v771_v2 = vld [vmem:[%s865_s19 + $0x48] sm:$0xff]   ;;  %v773_v4 = vld [vmem:[%s865_s19 + $0x50] sm:$0xff]   ;;  %s688_s26 = sshll.u32 %s922_s12, 5 }
  0x12   : > { %v770_v1 = vld [vmem:[%s865_s19] sm:$0xff]   ;;  %689 = vmatprep.subr.bf16.mxu0 %v769_v0  ;;  %729 = vmatprep.subr.bf16.mxu1 %v769_v0  ;;  %v772_v3 = vld [vmem:[%s865_s19 + $0x8] sm:$0xff]   ;;  %v774_v5 = vld [vmem:[%s865_s19 + $0x10] sm:$0xff]   ;;  %s231_s29 = scalar_lea.vmem %s916_s3, %s688_s26 }
  0x13   : > { %690 = vmatpush3.bf16.msra.mxu0 %v770_v1  ;;  %737 = vmatpush3.bf16.msra.mxu1 %v770_v1  ;;  %v775_v6 = vld [vmem:[%s865_s19 + $0x58] sm:$0xff]   ;;  %v777_v8 = vld [vmem:[%s865_s19 + $0x60] sm:$0xff]   ;;  %v779_v10 = vld [vmem:[%s865_s19 + $0x68] sm:$0xff]  }
  0x14   : > { %691 = vmatprep.subr.bf16.mxu0 %v771_v2  ;;  %730 = vmatprep.subr.bf16.mxu1 %v771_v2  ;;  %v776_v7 = vld [vmem:[%s865_s19 + $0x18] sm:$0xff]   ;;  %v778_v9 = vld [vmem:[%s865_s19 + $0x20] sm:$0xff]   ;;  %v780_v13 = vld [vmem:[%s865_s19 + $0x28] sm:$0xff]  }
  0x15   : > { %v787_v11 = vld [vmem:[%s880_s23 + $0x4] ss:$8 sps:$4 sm:$0xff]   ;;  %v781_v14 = vld [vmem:[%s865_s19 + $0x70] sm:$0xff]   ;;  %v783_v16 = vld [vmem:[%s865_s19 + $0x78] sm:$0xff]  }
  0x16   : > { %v790_v12 = vld [vmem:[%s880_s23 + $0x24] ss:$8 sps:$4 sm:$0xff]   ;;  %449 = vmatprep.mubr.bf16.mxu0 %v787_v11  ;;  %v782_v15 = vld [vmem:[%s865_s19 + $0x30] sm:$0xff]   ;;  %v784_v17 = vld [vmem:[%s865_s19 + $0x38] sm:$0xff]  }
  0x17   : > { %692 = vmatpush3.bf16.msra.mxu0 %v772_v3  ;;  %738 = vmatpush3.bf16.msra.mxu1 %v772_v3  ;;  %v785_v18 = vld [vmem:[%s880_s23] ss:$8 sps:$4 sm:$0xff]   ;;  %v791_v20 = vld [vmem:[%s880_s23 + $0x14] ss:$8 sps:$4 sm:$0xff]   ;;  %v795_v22 = vld [vmem:[%s880_s23 + $0x10] ss:$8 sps:$4 sm:$0xff]  }
  0x18   : > { %693 = vmatprep.subr.bf16.mxu0 %v773_v4  ;;  %731 = vmatprep.subr.bf16.mxu1 %v773_v4  ;;  %v788_v19 = vld [vmem:[%s880_s23 + $0x20] ss:$8 sps:$4 sm:$0xff]   ;;  %v793_v21 = vld [vmem:[%s880_s23 + $0x34] ss:$8 sps:$4 sm:$0xff]   ;;  %v796_v23 = vld [vmem:[%s880_s23 + $0x30] ss:$8 sps:$4 sm:$0xff]  }
  0x19   : > { %465 = vmatprep.mubr.bf16.mxu1 %v790_v12 }
  0x1b   : > { %694 = vmatpush3.bf16.msra.mxu0 %v774_v5  ;;  %739 = vmatpush3.bf16.msra.mxu1 %v774_v5 }
  0x1c   : > { %695 = vmatprep.subr.bf16.mxu0 %v775_v6  ;;  %732 = vmatprep.subr.bf16.mxu1 %v775_v6 }
  0x1f   : > { %696 = vmatpush3.bf16.msra.mxu0 %v776_v7  ;;  %740 = vmatpush3.bf16.msra.mxu1 %v776_v7 }
  0x20   : > { %697 = vmatprep.subr.bf16.mxu0 %v777_v8  ;;  %733 = vmatprep.subr.bf16.mxu1 %v777_v8 }
  0x23   : > { %698 = vmatpush3.bf16.msra.mxu0 %v778_v9  ;;  %741 = vmatpush3.bf16.msra.mxu1 %v778_v9 }
  0x24   : > { %699 = vmatprep.subr.bf16.mxu0 %v779_v10  ;;  %734 = vmatprep.subr.bf16.mxu1 %v779_v10 }
  0x27   : > { %700 = vmatpush3.bf16.msra.mxu0 %v780_v13  ;;  %742 = vmatpush3.bf16.msra.mxu1 %v780_v13 }
  0x28   : > { %701 = vmatprep.subr.bf16.mxu0 %v781_v14  ;;  %735 = vmatprep.subr.bf16.mxu1 %v781_v14 }
  0x2b   : > { %702 = vmatpush3.bf16.msra.mxu0 %v782_v15  ;;  %743 = vmatpush3.bf16.msra.mxu1 %v782_v15 }
  0x2c   : > { %703 = vmatprep.subr.bf16.mxu0 %v783_v16  ;;  %736 = vmatprep.subr.bf16.mxu1 %v783_v16 }
  0x2f   : > { %704 = vmatpush3.bf16.msra.mxu0 %v784_v17  ;;  %744 = vmatpush3.bf16.msra.mxu1 %v784_v17 }
  0x32   : > { %450 = vmatmul.mubr.bf16.vlgmr.msra.gmra.mrb[0].mxu0 %v785_v18  ;;  %466 = vmatmul.mubr.bf16.vlgmr.msra.gmra.mrb[0].mxu1 %v788_v19 }
  0x33   : > { %457 = vmatprep.mubr.bf16.mxu0 %v791_v20  ;;  %473 = vmatprep.mubr.bf16.mxu1 %v793_v21 }
  0x3a   : > { %458 = vmatmul.mubr.bf16.gmra.mrb[4].mxu0 %v795_v22  ;;  %474 = vmatmul.mubr.bf16.gmra.mrb[4].mxu1 %v796_v23 }
 0x105   : > { %v705_v24 = vpop.f32.mrb[0].mxu0  ;;  %v717_v25 = vpop.f32.mrb[0].mxu1 }
 0x106   : > { %v706_v27 = vpop.f32.mrb[1].mxu0  ;;  %v718_v28 = vpop.f32.mrb[1].mxu1 }
 0x107   : > { %v707_v29 = vadd.f32 %v706_v27, %v705_v24  ;;  %v719_v30 = vadd.f32 %v718_v28, %v717_v25  ;;  %v708_v31 = vpop.f32.mrb[2].mxu0  ;;  %v720_v32 = vpop.f32.mrb[2].mxu1 }
 0x108   : > { %v709_v33 = vpop.f32.mrb[3].mxu0  ;;  %v721_v34 = vpop.f32.mrb[3].mxu1 }
 0x109   : > { %v452_v35 = vadd.f32 %v707_v29, %v651_v26  ;;  %v468_v36 = vadd.f32 %v719_v30, %v651_v26  ;;  %v710_v37 = vadd.f32 %v709_v33, %v708_v31  ;;  %v722_v38 = vadd.f32 %v721_v34, %v720_v32 }
 0x10b   : > { %vm482_vm0 = vcmp.ge.f32.partialorder %v452_v35, 0.0  ;;  %v490_v39 = vmul.f32 0.2, %v452_v35  ;;  %vm486_vm1 = vcmp.ge.f32.partialorder %v468_v36, 0.0  ;;  %v494_v40 = vmul.f32 0.2, %v468_v36 }
 0x10c   : > { %v455_v41 = vadd.f32 %v710_v37, %v651_v26  ;;  %v471_v42 = vadd.f32 %v722_v38, %v651_v26 }
 0x10d   : > { %v498_v43 = vsel %vm482_vm0, %v452_v35, %v490_v39  ;;  %v502_v44 = vsel %vm486_vm1, %v468_v36, %v494_v40  ;;  %v711_v45 = vpop.f32.mrb[4].mxu0  ;;  %v723_v46 = vpop.f32.mrb[4].mxu1 }
 0x10e   : > { %v506_v47 = vmul.f32 1.4142135, %v498_v43  ;;  %v510_v48 = vmul.f32 1.4142135, %v502_v44  ;;  %vm483_vm2 = vcmp.ge.f32.partialorder %v455_v41, 0.0  ;;  %vm487_vm3 = vcmp.ge.f32.partialorder %v471_v42, 0.0 }
 0x10f   : > { %v491_v49 = vmul.f32 0.2, %v455_v41  ;;  %v495_v50 = vmul.f32 0.2, %v471_v42  ;;  %v712_v51 = vpop.f32.mrb[5].mxu0  ;;  %v724_v52 = vpop.f32.mrb[5].mxu1 }
 0x110   : > { %v713_v53 = vadd.f32 %v712_v51, %v711_v45  ;;  %v725_v54 = vadd.f32 %v724_v52, %v723_v46  ;;  %v714_v55 = vpop.f32.mrb[6].mxu0  ;;  %v726_v56 = vpop.f32.mrb[6].mxu1  ;;  %v676_v1 = vclamps-f32 %v506_v47, 256.0  ;;  %v680_v2 = vclamps-f32 %v510_v48, 256.0 }
 0x111   : > { %v499_v57 = vsel %vm483_vm2, %v455_v41, %v491_v49  ;;  %v503_v58 = vsel %vm487_vm3, %v471_v42, %v495_v50  ;;  %v715_v59 = vpop.f32.mrb[7].mxu0  ;;  %v727_v60 = vpop.f32.mrb[7].mxu1 }
 0x112   : > { %v507_v61 = vmul.f32 1.4142135, %v499_v57  ;;  %v511_v62 = vmul.f32 1.4142135, %v503_v58  ;;  %v460_v63 = vadd.f32 %v713_v53, %v651_v26  ;;  %v476_v0 = vadd.f32 %v725_v54, %v651_v26 }
 0x113   : > { %v716_v3 = vadd.f32 %v715_v59, %v714_v55  ;;  %v728_v4 = vadd.f32 %v727_v60, %v726_v56 }
 0x114   : > { %v677_v5 = vclamps-f32 %v507_v61, 256.0  ;;  %v681_v6 = vclamps-f32 %v511_v62, 256.0  ;;  %vm484_vm4 = vcmp.ge.f32.partialorder %v460_v63, 0.0  ;;  %v492_v7 = vmul.f32 0.2, %v460_v63 }
 0x115   : > { %vm488_vm5 = vcmp.ge.f32.partialorder %v476_v0, 0.0  ;;  %v496_v8 = vmul.f32 0.2, %v476_v0  ;;  %v463_v9 = vadd.f32 %v716_v3, %v651_v26  ;;  %v479_v10 = vadd.f32 %v728_v4, %v651_v26 }
 0x116   : > { %v530_v11 = vpack.c.bf16 %v677_v5, %v676_v1  ;;  %v532_v12 = vpack.c.bf16 %v681_v6, %v680_v2  ;;  %v500_v13 = vsel %vm484_vm4, %v460_v63, %v492_v7 }
 0x117   : > { %v504_v14 = vsel %vm488_vm5, %v476_v0, %v496_v8  ;;  %vm485_vm6 = vcmp.ge.f32.partialorder %v463_v9, 0.0  ;;  %v493_v15 = vmul.f32 0.2, %v463_v9  ;;  %v508_v16 = vmul.f32 1.4142135, %v500_v13 }
 0x118   : > { %534 = vst [vmem:[%s231_s29] sm:$0xff] %v530_v11  ;;  %536 = vst [vmem:[%s231_s29 + $0x10] sm:$0xff] %v532_v12  ;;  %vm489_vm7 = vcmp.ge.f32.partialorder %v479_v10, 0.0  ;;  %v497_v17 = vmul.f32 0.2, %v479_v10  ;;  %v512_v18 = vmul.f32 1.4142135, %v504_v14 }
 0x119   : > { %v501_v19 = vsel %vm485_vm6, %v463_v9, %v493_v15  ;;  %v678_v23 = vclamps-f32 %v508_v16, 256.0 }
 0x11a   : > { %v509_v20 = vmul.f32 1.4142135, %v501_v19  ;;  %v505_v21 = vsel %vm489_vm7, %v479_v10, %v497_v17  ;;  %v682_v25 = vclamps-f32 %v512_v18, 256.0 }
 0x11b   : > { %v513_v22 = vmul.f32 1.4142135, %v505_v21 }
 0x11c   : > { %v679_v24 = vclamps-f32 %v509_v20, 256.0 }
 0x11d   : > { %v683_v26 = vclamps-f32 %v513_v22, 256.0 }
 0x11e   : > { %v531_v27 = vpack.c.bf16 %v679_v24, %v678_v23 }
 0x11f   : > { %v533_v28 = vpack.c.bf16 %v683_v26, %v682_v25 }
 0x120   : > { %535 = vst [vmem:[%s231_s29 + $0x8] sm:$0xff] %v531_v27 }
 0x121   : > { %537 = vst [vmem:[%s231_s29 + $0x18] sm:$0xff] %v533_v28 }
 0x122 PF: > { %s13_s14 = sadd.s32 1, %s819_s14   ;;  %s917_s12 = smov %s815_s13 }
 0x123   : > { %p10_p5 = scmp.ge.s32.totalorder %s13_s14, 4   ;;  %s918_s13 = smov %s920_s15 }
 0x125   :  { %12 = sbr.rel (!%p10_p5) target bundleno = 2 (0x2), region = 65 }

// kernel: tile.18
= control target key start
LH: loop header
LB: loop body
LE: loop exit
PB: predicated region body
PF: predicated region fallthrough
CT: control target
= control target key end

     0   :  { %s22_s0 = inlined_call_operand.vmem [shape: f32[8], index: 0, kind: input, shape index: {}]   ;;  %s23_s1 = inlined_call_operand.vmem [shape: f32[4,8], index: 1, kind: output, shape index: {}]  }
   0x1   :  { %v4_v0 = vld [vmem:[%s22_s0] ss:$0 sm:$0xff] }
   0x2   :  { %5 = vst [vmem:[%s23_s1] sm:$0xf] %v4_v0 }

// kernel: tile.19
= control target key start
LH: loop header
LB: loop body
LE: loop exit
PB: predicated region body
PF: predicated region fallthrough
CT: control target
= control target key end

     0   :  { %vm7_vm0 = vcmask 64512   ;;  %s37_s8 = smov 8   ;;  %s38_s9 = smov 16   ;;  %vm13_vm1 = vcmask 261312   ;;  %vm19_vm2 = vcmask 195712   ;;  %vm25_vm3 = vcmask 130112   ;;  %s55_s0 = inlined_call_operand.vmem [shape: f32[4,8], index: 0, kind: input, shape index: {}]   ;;  %s56_s1 = inlined_call_operand.vmem [shape: f32[32], index: 1, kind: output, shape index: {}]  }
   0x1   :  { %v4_v0 = vld [vmem:[%s55_s0] sm:$0xf]  ;;  %s36_s0 = smov 24  }
   0x2   :  { %5 = vst [vmem:[#allocation1] sm:$0xf] %v4_v0 }
   0x9   :  { %v10_v1 = vld [vmem:[#allocation1 + $0x3] sm:$0x1]   ;;  %v22_v2 = vld [vmem:[#allocation1 + $0x1] sm:$0x1]   ;;  %v6_v3 = vld [vmem:[#allocation1] sm:$0x1]  }
   0xa   :  { %11 = vrot.lane.b32.xlu0 %v10_v1, %s36_s0  ;;  %23 = vrot.lane.b32.xlu1 %v22_v2, %s37_s8  ;;  %v16_v4 = vld [vmem:[#allocation1 + $0x2] sm:$0x1]   ;;  %8 = vst.msk [vmem:[#allocation0] sm:$0x1] %vm7_vm0, %v6_v3  }
   0xe   :  { %17 = vrot.lane.b32.xlu0 %v16_v4, %s38_s9 }
  0x7c   :  { %v12_v5 = vpop.permute.xlu0 %11   ;;  %v24_v6 = vpop.permute.xlu1 %23  }
  0x7d   :  { %14 = vst.msk [vmem:[#allocation0] sm:$0x1] %vm13_vm1, %v12_v5  }
  0x80   :  { %v18_v7 = vpop.permute.xlu0 %17  }
  0x81   :  { %20 = vst.msk [vmem:[#allocation0] sm:$0x1] %vm19_vm2, %v18_v7  }
  0x82   :  { %26 = vst.msk [vmem:[#allocation0] sm:$0x1] %vm25_vm3, %v24_v6  }
  0x89   :  { %v30_v8 = vld [vmem:[#allocation0] sm:$0x1] }
  0x8a   :  { %32 = vst [vmem:[%s56_s1] sm:$0x1] %v30_v8 }

// kernel: synthesis_forward.8
= control target key start
LH: loop header
LB: loop body
LE: loop exit
PB: predicated region body
PF: predicated region fallthrough
CT: control target
= control target key end

     0   :  { %s912_s12 = smov 0   ;;  %s914_s13 = smov 0   ;;  %s984_s0 = inlined_call_operand.vmem [shape: bf16[2,64,256], index: 0, kind: input, shape index: {}]   ;;  %s985_s1 = inlined_call_operand.vmem [shape: bf16[2,256,128], index: 1, kind: input, shape index: {}]   ;;  %s986_s2 = inlined_call_operand.vmem [shape: f32[1,128], index: 2, kind: input, shape index: {}]   ;;  %s987_s3 = inlined_call_operand.vmem [shape: bf16[2,64,128], index: 3, kind: output, shape index: {}]  }
   0x1   :  { %s916_s14 = smov 0  }
   0x2 LB: > { %s25_s15 = sadd.s32 1, %s886_s13  ;;  %p676_p0 = scmp.ge.s32.totalorder %s890_s14, 1  ;;  %s890_s14 = sphi %s916_s14, %s13_s14   ;;  %s886_s13 = sphi %s914_s13, %s989_s13   ;;  %s882_s12 = sphi %s912_s12, %s988_s12  }
   0x3   : > { %p27_p1 = scmp.ge.s32.totalorder %s25_s15, 2  ;;  %p169_p2 = scmp.lt.s32.totalorder %s890_s14, 3 }
   0x5   : > { %s991_s15 = smov (%p27_p1, %s25_s15), 0  ;;  %p170_p3 = pnand %p676_p0, %p169_p2 }
   0x6   : > { %p208_p4 = scmp.lt.s32.totalorder (!%p170_p3), %s882_s12, 1  ;;  %v683_v26 = vld [vmem:[%s986_s2] ss:$0 sm:$0xff] (!%p170_p3) }
   0x7   : > { %173 = sbr.rel (%p170_p3) target bundleno = 290 (0x122), region = 32 }
   0xe   : > { %s993_s12 = smov (!%p208_p4, %s882_s12), 1 }
   0xf   : > { %s727_s16 = sshll.u32 %s993_s12, 7  ;;  %s726_s20 = sshll.u32 %s993_s12, 6 }
  0x10   : > { %s936_s19 = scalar_lea.vmem %s985_s1, %s727_s16  ;;  %s951_s23 = scalar_lea.vmem %s984_s0, %s726_s20 }
  0x11   : > { %v840_v0 = vld [vmem:[%s936_s19 + $0x40] sm:$0xff]   ;;  %v842_v2 = vld [vmem:[%s936_s19 + $0x48] sm:$0xff]   ;;  %v844_v4 = vld [vmem:[%s936_s19 + $0x50] sm:$0xff]   ;;  %s728_s26 = sshll.u32 %s993_s12, 5 }
  0x12   : > { %v841_v1 = vld [vmem:[%s936_s19] sm:$0xff]   ;;  %760 = vmatprep.subr.bf16.mxu0 %v840_v0  ;;  %800 = vmatprep.subr.bf16.mxu1 %v840_v0  ;;  %v843_v3 = vld [vmem:[%s936_s19 + $0x8] sm:$0xff]   ;;  %v845_v5 = vld [vmem:[%s936_s19 + $0x10] sm:$0xff]   ;;  %s231_s29 = scalar_lea.vmem %s987_s3, %s728_s26 }
  0x13   : > { %761 = vmatpush3.bf16.msra.mxu0 %v841_v1  ;;  %808 = vmatpush3.bf16.msra.mxu1 %v841_v1  ;;  %v846_v6 = vld [vmem:[%s936_s19 + $0x58] sm:$0xff]   ;;  %v848_v8 = vld [vmem:[%s936_s19 + $0x60] sm:$0xff]   ;;  %v850_v10 = vld [vmem:[%s936_s19 + $0x68] sm:$0xff]  }
  0x14   : > { %762 = vmatprep.subr.bf16.mxu0 %v842_v2  ;;  %801 = vmatprep.subr.bf16.mxu1 %v842_v2  ;;  %v847_v7 = vld [vmem:[%s936_s19 + $0x18] sm:$0xff]   ;;  %v849_v9 = vld [vmem:[%s936_s19 + $0x20] sm:$0xff]   ;;  %v851_v13 = vld [vmem:[%s936_s19 + $0x28] sm:$0xff]  }
  0x15   : > { %v858_v11 = vld [vmem:[%s951_s23 + $0x4] ss:$8 sps:$4 sm:$0xff]   ;;  %v852_v14 = vld [vmem:[%s936_s19 + $0x70] sm:$0xff]   ;;  %v854_v16 = vld [vmem:[%s936_s19 + $0x78] sm:$0xff]  }
  0x16   : > { %v861_v12 = vld [vmem:[%s951_s23 + $0x24] ss:$8 sps:$4 sm:$0xff]   ;;  %449 = vmatprep.mubr.bf16.mxu0 %v858_v11  ;;  %v853_v15 = vld [vmem:[%s936_s19 + $0x30] sm:$0xff]   ;;  %v855_v17 = vld [vmem:[%s936_s19 + $0x38] sm:$0xff]  }
  0x17   : > { %763 = vmatpush3.bf16.msra.mxu0 %v843_v3  ;;  %809 = vmatpush3.bf16.msra.mxu1 %v843_v3  ;;  %v856_v18 = vld [vmem:[%s951_s23] ss:$8 sps:$4 sm:$0xff]   ;;  %v862_v20 = vld [vmem:[%s951_s23 + $0x14] ss:$8 sps:$4 sm:$0xff]   ;;  %v866_v22 = vld [vmem:[%s951_s23 + $0x10] ss:$8 sps:$4 sm:$0xff]  }
  0x18   : > { %764 = vmatprep.subr.bf16.mxu0 %v844_v4  ;;  %802 = vmatprep.subr.bf16.mxu1 %v844_v4  ;;  %v859_v19 = vld [vmem:[%s951_s23 + $0x20] ss:$8 sps:$4 sm:$0xff]   ;;  %v864_v21 = vld [vmem:[%s951_s23 + $0x34] ss:$8 sps:$4 sm:$0xff]   ;;  %v867_v23 = vld [vmem:[%s951_s23 + $0x30] ss:$8 sps:$4 sm:$0xff]  }
  0x19   : > { %465 = vmatprep.mubr.bf16.mxu1 %v861_v12 }
  0x1b   : > { %765 = vmatpush3.bf16.msra.mxu0 %v845_v5  ;;  %810 = vmatpush3.bf16.msra.mxu1 %v845_v5 }
  0x1c   : > { %766 = vmatprep.subr.bf16.mxu0 %v846_v6  ;;  %803 = vmatprep.subr.bf16.mxu1 %v846_v6 }
  0x1f   : > { %767 = vmatpush3.bf16.msra.mxu0 %v847_v7  ;;  %811 = vmatpush3.bf16.msra.mxu1 %v847_v7 }
  0x20   : > { %768 = vmatprep.subr.bf16.mxu0 %v848_v8  ;;  %804 = vmatprep.subr.bf16.mxu1 %v848_v8 }
  0x23   : > { %769 = vmatpush3.bf16.msra.mxu0 %v849_v9  ;;  %812 = vmatpush3.bf16.msra.mxu1 %v849_v9 }
  0x24   : > { %770 = vmatprep.subr.bf16.mxu0 %v850_v10  ;;  %805 = vmatprep.subr.bf16.mxu1 %v850_v10 }
  0x27   : > { %771 = vmatpush3.bf16.msra.mxu0 %v851_v13  ;;  %813 = vmatpush3.bf16.msra.mxu1 %v851_v13 }
  0x28   : > { %772 = vmatprep.subr.bf16.mxu0 %v852_v14  ;;  %806 = vmatprep.subr.bf16.mxu1 %v852_v14 }
  0x2b   : > { %773 = vmatpush3.bf16.msra.mxu0 %v853_v15  ;;  %814 = vmatpush3.bf16.msra.mxu1 %v853_v15 }
  0x2c   : > { %774 = vmatprep.subr.bf16.mxu0 %v854_v16  ;;  %807 = vmatprep.subr.bf16.mxu1 %v854_v16 }
  0x2f   : > { %775 = vmatpush3.bf16.msra.mxu0 %v855_v17  ;;  %815 = vmatpush3.bf16.msra.mxu1 %v855_v17 }
  0x32   : > { %450 = vmatmul.mubr.bf16.vlgmr.msra.gmra.mrb[0].mxu0 %v856_v18  ;;  %466 = vmatmul.mubr.bf16.vlgmr.msra.gmra.mrb[0].mxu1 %v859_v19 }
  0x33   : > { %457 = vmatprep.mubr.bf16.mxu0 %v862_v20  ;;  %473 = vmatprep.mubr.bf16.mxu1 %v864_v21 }
  0x3a   : > { %458 = vmatmul.mubr.bf16.gmra.mrb[4].mxu0 %v866_v22  ;;  %474 = vmatmul.mubr.bf16.gmra.mrb[4].mxu1 %v867_v23 }
 0x105   : > { %v776_v24 = vpop.f32.mrb[0].mxu0  ;;  %v788_v25 = vpop.f32.mrb[0].mxu1 }
 0x106   : > { %v777_v27 = vpop.f32.mrb[1].mxu0  ;;  %v789_v28 = vpop.f32.mrb[1].mxu1 }
 0x107   : > { %v778_v29 = vadd.f32 %v777_v27, %v776_v24  ;;  %v790_v30 = vadd.f32 %v789_v28, %v788_v25  ;;  %v779_v31 = vpop.f32.mrb[2].mxu0  ;;  %v791_v32 = vpop.f32.mrb[2].mxu1 }
 0x108   : > { %v780_v33 = vpop.f32.mrb[3].mxu0  ;;  %v792_v34 = vpop.f32.mrb[3].mxu1 }
 0x109   : > { %v452_v35 = vadd.f32 %v778_v29, %v683_v26  ;;  %v468_v36 = vadd.f32 %v790_v30, %v683_v26  ;;  %v781_v37 = vadd.f32 %v780_v33, %v779_v31  ;;  %v793_v38 = vadd.f32 %v792_v34, %v791_v32 }
 0x10b   : > { %vm482_vm0 = vcmp.ge.f32.partialorder %v452_v35, 0.0  ;;  %v490_v39 = vmul.f32 0.2, %v452_v35  ;;  %vm486_vm1 = vcmp.ge.f32.partialorder %v468_v36, 0.0  ;;  %v494_v40 = vmul.f32 0.2, %v468_v36 }
 0x10c   : > { %v455_v41 = vadd.f32 %v781_v37, %v683_v26  ;;  %v471_v42 = vadd.f32 %v793_v38, %v683_v26 }
 0x10d   : > { %v498_v43 = vsel %vm482_vm0, %v452_v35, %v490_v39  ;;  %v502_v44 = vsel %vm486_vm1, %v468_v36, %v494_v40  ;;  %v782_v45 = vpop.f32.mrb[4].mxu0  ;;  %v794_v46 = vpop.f32.mrb[4].mxu1 }
 0x10e   : > { %v506_v47 = vmul.f32 1.4142135, %v498_v43  ;;  %v510_v48 = vmul.f32 1.4142135, %v502_v44  ;;  %vm483_vm2 = vcmp.ge.f32.partialorder %v455_v41, 0.0  ;;  %vm487_vm3 = vcmp.ge.f32.partialorder %v471_v42, 0.0 }
 0x10f   : > { %v491_v49 = vmul.f32 0.2, %v455_v41  ;;  %v495_v50 = vmul.f32 0.2, %v471_v42  ;;  %v783_v51 = vpop.f32.mrb[5].mxu0  ;;  %v795_v52 = vpop.f32.mrb[5].mxu1 }
 0x110   : > { %v784_v53 = vadd.f32 %v783_v51, %v782_v45  ;;  %v796_v54 = vadd.f32 %v795_v52, %v794_v46  ;;  %v785_v55 = vpop.f32.mrb[6].mxu0  ;;  %v797_v56 = vpop.f32.mrb[6].mxu1  ;;  %v708_v1 = vclamps-f32 %v506_v47, 256.0  ;;  %v712_v2 = vclamps-f32 %v510_v48, 256.0 }
 0x111   : > { %v499_v57 = vsel %vm483_vm2, %v455_v41, %v491_v49  ;;  %v503_v58 = vsel %vm487_vm3, %v471_v42, %v495_v50  ;;  %v786_v59 = vpop.f32.mrb[7].mxu0  ;;  %v798_v60 = vpop.f32.mrb[7].mxu1 }
 0x112   : > { %v507_v61 = vmul.f32 1.4142135, %v499_v57  ;;  %v511_v62 = vmul.f32 1.4142135, %v503_v58  ;;  %v460_v63 = vadd.f32 %v784_v53, %v683_v26  ;;  %v476_v0 = vadd.f32 %v796_v54, %v683_v26 }
 0x113   : > { %v787_v3 = vadd.f32 %v786_v59, %v785_v55  ;;  %v799_v4 = vadd.f32 %v798_v60, %v797_v56 }
 0x114   : > { %v709_v5 = vclamps-f32 %v507_v61, 256.0  ;;  %v713_v6 = vclamps-f32 %v511_v62, 256.0  ;;  %vm484_vm4 = vcmp.ge.f32.partialorder %v460_v63, 0.0  ;;  %v492_v7 = vmul.f32 0.2, %v460_v63 }
 0x115   : > { %vm488_vm5 = vcmp.ge.f32.partialorder %v476_v0, 0.0  ;;  %v496_v8 = vmul.f32 0.2, %v476_v0  ;;  %v463_v9 = vadd.f32 %v787_v3, %v683_v26  ;;  %v479_v10 = vadd.f32 %v799_v4, %v683_v26 }
 0x116   : > { %v740_v11 = vpack.c.bf16 %v709_v5, %v708_v1  ;;  %v750_v12 = vpack.c.bf16 %v713_v6, %v712_v2  ;;  %v500_v13 = vsel %vm484_vm4, %v460_v63, %v492_v7 }
 0x117   : > { %v504_v14 = vsel %vm488_vm5, %v476_v0, %v496_v8  ;;  %vm485_vm6 = vcmp.ge.f32.partialorder %v463_v9, 0.0  ;;  %v493_v15 = vmul.f32 0.2, %v463_v9  ;;  %v508_v16 = vmul.f32 1.4142135, %v500_v13 }
 0x118   : > { %741 = vst [vmem:[%s231_s29] sm:$0xff] %v740_v11   ;;  %758 = vst [vmem:[%s231_s29 + $0x10] sm:$0xff] %v750_v12   ;;  %vm489_vm7 = vcmp.ge.f32.partialorder %v479_v10, 0.0  ;;  %v497_v17 = vmul.f32 0.2, %v479_v10  ;;  %v512_v18 = vmul.f32 1.4142135, %v504_v14 }
 0x119   : > { %v501_v19 = vsel %vm485_vm6, %v463_v9, %v493_v15  ;;  %v710_v23 = vclamps-f32 %v508_v16, 256.0 }
 0x11a   : > { %v509_v20 = vmul.f32 1.4142135, %v501_v19  ;;  %v505_v21 = vsel %vm489_vm7, %v479_v10, %v497_v17  ;;  %v714_v25 = vclamps-f32 %v512_v18, 256.0 }
 0x11b   : > { %v513_v22 = vmul.f32 1.4142135, %v505_v21 }
 0x11c   : > { %v711_v24 = vclamps-f32 %v509_v20, 256.0 }
 0x11d   : > { %v715_v26 = vclamps-f32 %v513_v22, 256.0 }
 0x11e   : > { %v745_v27 = vpack.c.bf16 %v711_v24, %v710_v23 }
 0x11f   : > { %v755_v28 = vpack.c.bf16 %v715_v26, %v714_v25 }
 0x120   : > { %757 = vst [vmem:[%s231_s29 + $0x8] sm:$0xff] %v745_v27  }
 0x121   : > { %759 = vst [vmem:[%s231_s29 + $0x18] sm:$0xff] %v755_v28  }
 0x122 PF: > { %s13_s14 = sadd.s32 1, %s890_s14   ;;  %s988_s12 = smov %s886_s13 }
 0x123   : > { %p10_p5 = scmp.ge.s32.totalorder %s13_s14, 4   ;;  %s989_s13 = smov %s991_s15 }
 0x125   :  { %12 = sbr.rel (!%p10_p5) target bundleno = 2 (0x2), region = 65 }

// kernel: synthesis_forward.9
= control target key start
LH: loop header
LB: loop body
LE: loop exit
PB: predicated region body
PF: predicated region fallthrough
CT: control target
= control target key end

     0   :  { %s1167_s12 = smov 0   ;;  %s1169_s13 = smov 0   ;;  %s1330_s0 = inlined_call_operand.vmem [shape: bf16[2,256,128], index: 0, kind: input, shape index: {}]   ;;  %s1331_s1 = inlined_call_operand.vmem [shape: bf16[2,128,128], index: 1, kind: input, shape index: {}]   ;;  %s1332_s2 = inlined_call_operand.vmem [shape: f32[1,128], index: 2, kind: input, shape index: {}]   ;;  %s1333_s3 = inlined_call_operand.vmem [shape: bf16[2,256,128], index: 3, kind: output, shape index: {}]  }
   0x1   :  { %s1171_s14 = smov 0  }
   0x2 LB: > { %s25_s15 = sadd.s32 1, %s1141_s13  ;;  %p918_p0 = scmp.ge.s32.totalorder %s1145_s14, 1  ;;  %s1145_s14 = sphi %s1171_s14, %s13_s14   ;;  %s1141_s13 = sphi %s1169_s13, %s1335_s13   ;;  %s1137_s12 = sphi %s1167_s12, %s1334_s12  }
   0x3   : > { %p27_p1 = scmp.ge.s32.totalorder %s25_s15, 2  ;;  %p168_p2 = scmp.lt.s32.totalorder %s1145_s14, 3 }
   0x5   : > { %s1337_s15 = smov (%p27_p1, %s25_s15), 0  ;;  %p169_p3 = pnand %p918_p0, %p168_p2 }
   0x6   : > { %p206_p4 = scmp.lt.s32.totalorder (!%p169_p3), %s1137_s12, 1  ;;  %v1228_v24 = vld [vmem:[%s1332_s2] ss:$0 sm:$0xff] (!%p169_p3) }
   0x7   : > { %172 = sbr.rel (%p169_p3) target bundleno = 319 (0x13f), region = 32 }
   0xe   : > { %s1339_s12 = smov (!%p206_p4, %s1137_s12), 1 }
   0xf   : > { %s985_s16 = sshll.u32 %s1339_s12, 6  ;;  %s984_s20 = sshll.u32 %s1339_s12, 7 }
  0x10   : > { %s1191_s19 = scalar_lea.vmem %s1331_s1, %s985_s16  ;;  %s1202_s23 = scalar_lea.vmem %s1330_s0, %s984_s20 }
  0x11   : > { %v1099_v0 = vld [vmem:[%s1191_s19] sm:$0xff]   ;;  %v1100_v1 = vld [vmem:[%s1191_s19 + $0x8] sm:$0xff]   ;;  %v1101_v2 = vld [vmem:[%s1191_s19 + $0x10] sm:$0xff]   ;;  %s1251_s28 = scalar_lea.vmem %s1333_s3, %s984_s20 }
  0x12   : > { %1011 = vmatprep.subr.bf16.mxu0 %v1099_v0  ;;  %1059 = vmatprep.subr.bf16.mxu1 %v1099_v0  ;;  %v1102_v3 = vld [vmem:[%s1191_s19 + $0x18] sm:$0xff]   ;;  %v1107_v4 = vld [vmem:[%s1202_s23] sm:$0xff]   ;;  %v1104_v7 = vld [vmem:[%s1191_s19 + $0x28] sm:$0xff]  }
  0x13   : > { %1012 = vmatpush3.bf16.msra.mxu0 %v1099_v0  ;;  %1067 = vmatpush3.bf16.msra.mxu1 %v1099_v0  ;;  %v1108_v5 = vld [vmem:[%s1202_s23 + $0x40] sm:$0xff]   ;;  %v1105_v8 = vld [vmem:[%s1191_s19 + $0x30] sm:$0xff]   ;;  %v1106_v9 = vld [vmem:[%s1191_s19 + $0x38] sm:$0xff]  }
  0x14   : > { %1013 = vmatprep.subr.bf16.mxu0 %v1100_v1  ;;  %1060 = vmatprep.subr.bf16.mxu1 %v1100_v1  ;;  %v1103_v6 = vld [vmem:[%s1191_s19 + $0x20] sm:$0xff]   ;;  %v1109_v10 = vld [vmem:[%s1202_s23 + $0x8] sm:$0xff]   ;;  %v1111_v12 = vld [vmem:[%s1202_s23 + $0x10] sm:$0xff]  }
  0x15   : > { %1027 = vmatprep.mubr.bf16.mxu0 %v1107_v4  ;;  %1043 = vmatprep.mubr.bf16.mxu1 %v1108_v5  ;;  %v1110_v11 = vld [vmem:[%s1202_s23 + $0x48] sm:$0xff]   ;;  %v1112_v13 = vld [vmem:[%s1202_s23 + $0x50] sm:$0xff]   ;;  %v1113_v14 = vld [vmem:[%s1202_s23 + $0x18] sm:$0xff]  }
  0x16   : > { %v1114_v15 = vld [vmem:[%s1202_s23 + $0x58] sm:$0xff]   ;;  %v1115_v16 = vld [vmem:[%s1202_s23 + $0x20] sm:$0xff]   ;;  %v1117_v18 = vld [vmem:[%s1202_s23 + $0x28] sm:$0xff]  }
  0x17   : > { %1014 = vmatpush3.bf16.msra.mxu0 %v1100_v1  ;;  %1068 = vmatpush3.bf16.msra.mxu1 %v1100_v1  ;;  %v1116_v17 = vld [vmem:[%s1202_s23 + $0x60] sm:$0xff]   ;;  %v1118_v19 = vld [vmem:[%s1202_s23 + $0x68] sm:$0xff]   ;;  %v1119_v20 = vld [vmem:[%s1202_s23 + $0x30] sm:$0xff]  }
  0x18   : > { %1015 = vmatprep.subr.bf16.mxu0 %v1101_v2  ;;  %1061 = vmatprep.subr.bf16.mxu1 %v1101_v2  ;;  %v1120_v21 = vld [vmem:[%s1202_s23 + $0x70] sm:$0xff]   ;;  %v1121_v22 = vld [vmem:[%s1202_s23 + $0x38] sm:$0xff]  }
  0x19   : > { %v1122_v23 = vld [vmem:[%s1202_s23 + $0x78] sm:$0xff]  }
  0x1b   : > { %1016 = vmatpush3.bf16.msra.mxu0 %v1101_v2  ;;  %1069 = vmatpush3.bf16.msra.mxu1 %v1101_v2 }
  0x1c   : > { %1017 = vmatprep.subr.bf16.mxu0 %v1102_v3  ;;  %1062 = vmatprep.subr.bf16.mxu1 %v1102_v3 }
  0x1f   : > { %1018 = vmatpush3.bf16.msra.mxu0 %v1102_v3  ;;  %1070 = vmatpush3.bf16.msra.mxu1 %v1102_v3 }
  0x20   : > { %1019 = vmatprep.subr.bf16.mxu0 %v1103_v6  ;;  %1063 = vmatprep.subr.bf16.mxu1 %v1103_v6 }
  0x23   : > { %1020 = vmatpush3.bf16.msra.mxu0 %v1103_v6  ;;  %1071 = vmatpush3.bf16.msra.mxu1 %v1103_v6 }
  0x24   : > { %1021 = vmatprep.subr.bf16.mxu0 %v1104_v7  ;;  %1064 = vmatprep.subr.bf16.mxu1 %v1104_v7 }
  0x27   : > { %1022 = vmatpush3.bf16.msra.mxu0 %v1104_v7  ;;  %1072 = vmatpush3.bf16.msra.mxu1 %v1104_v7 }
  0x28   : > { %1023 = vmatprep.subr.bf16.mxu0 %v1105_v8  ;;  %1065 = vmatprep.subr.bf16.mxu1 %v1105_v8 }
  0x2b   : > { %1024 = vmatpush3.bf16.msra.mxu0 %v1105_v8  ;;  %1073 = vmatpush3.bf16.msra.mxu1 %v1105_v8 }
  0x2c   : > { %1025 = vmatprep.subr.bf16.mxu0 %v1106_v9  ;;  %1066 = vmatprep.subr.bf16.mxu1 %v1106_v9 }
  0x2f   : > { %1026 = vmatpush3.bf16.msra.mxu0 %v1106_v9  ;;  %1074 = vmatpush3.bf16.msra.mxu1 %v1106_v9 }
  0x32   : > { %1028 = vmatmul.mubr.bf16.vlgmr.msra.gmra.mrb[0].mxu0 %v1109_v10  ;;  %1044 = vmatmul.mubr.bf16.vlgmr.msra.gmra.mrb[0].mxu1 %v1110_v11 }
  0x33   : > { %1031 = vmatprep.mubr.bf16.mxu0 %v1111_v12  ;;  %1047 = vmatprep.mubr.bf16.mxu1 %v1112_v13 }
  0x3a   : > { %1032 = vmatmul.mubr.bf16.gmra.mrb[4].mxu0 %v1113_v14  ;;  %1048 = vmatmul.mubr.bf16.gmra.mrb[4].mxu1 %v1114_v15 }
  0x3b   : > { %1035 = vmatprep.mubr.bf16.mxu0 %v1115_v16  ;;  %1051 = vmatprep.mubr.bf16.mxu1 %v1116_v17 }
  0x42   : > { %1036 = vmatmul.mubr.bf16.gmra.mrb[8].mxu0 %v1117_v18  ;;  %1052 = vmatmul.mubr.bf16.gmra.mrb[8].mxu1 %v1118_v19 }
  0x43   : > { %1039 = vmatprep.mubr.bf16.mxu0 %v1119_v20  ;;  %1055 = vmatprep.mubr.bf16.mxu1 %v1120_v21 }
  0x4a   : > { %1040 = vmatmul.mubr.bf16.gmra.mrb[12].mxu0 %v1121_v22  ;;  %1056 = vmatmul.mubr.bf16.gmra.mrb[12].mxu1 %v1122_v23 }
 0x105   : > { %v1029_v25 = vpop.f32.mrb[0].mxu0  ;;  %v1045_v26 = vpop.f32.mrb[0].mxu1 }
 0x106   : > { %v473_v27 = vadd.f32 %v1029_v25, %v1228_v24  ;;  %v537_v28 = vadd.f32 %v1045_v26, %v1228_v24  ;;  %v464_v29 = vpop.f32.mrb[1].mxu0  ;;  %v528_v30 = vpop.f32.mrb[1].mxu1 }
 0x107   : > { %v465_v31 = vadd.f32 %v1228_v24, %v464_v29  ;;  %v529_v32 = vadd.f32 %v1228_v24, %v528_v30  ;;  %v1030_v33 = vpop.f32.mrb[2].mxu0  ;;  %v1046_v34 = vpop.f32.mrb[2].mxu1 }
 0x108   : > { %vm593_vm0 = vcmp.ge.f32.partialorder %v473_v27, 0.0  ;;  %v625_v35 = vmul.f32 0.2, %v473_v27  ;;  %vm609_vm1 = vcmp.ge.f32.partialorder %v537_v28, 0.0  ;;  %v641_v36 = vmul.f32 0.2, %v537_v28 }
 0x109   : > { %vm591_vm2 = vcmp.ge.f32.partialorder %v465_v31, 0.0  ;;  %v623_v37 = vmul.f32 0.2, %v465_v31  ;;  %vm607_vm3 = vcmp.ge.f32.partialorder %v529_v32, 0.0  ;;  %v639_v38 = vmul.f32 0.2, %v529_v32 }
 0x10a   : > { %v657_v39 = vsel %vm593_vm0, %v473_v27, %v625_v35  ;;  %v673_v40 = vsel %vm609_vm1, %v537_v28, %v641_v36  ;;  %v476_v41 = vadd.f32 %v1030_v33, %v1228_v24  ;;  %v540_v42 = vadd.f32 %v1046_v34, %v1228_v24  ;;  %v467_v43 = vpop.f32.mrb[3].mxu0  ;;  %v531_v44 = vpop.f32.mrb[3].mxu1 }
 0x10b   : > { %v689_v45 = vmul.f32 1.4142135, %v657_v39  ;;  %v705_v46 = vmul.f32 1.4142135, %v673_v40  ;;  %v655_v47 = vsel %vm591_vm2, %v465_v31, %v623_v37  ;;  %v671_v48 = vsel %vm607_vm3, %v529_v32, %v639_v38 }
 0x10c   : > { %v1236_v49 = vmul.f32 1.4142135, %v655_v47  ;;  %v1238_v50 = vmul.f32 1.4142135, %v671_v48  ;;  %vm594_vm4 = vcmp.ge.f32.partialorder %v476_v41, 0.0  ;;  %vm610_vm5 = vcmp.ge.f32.partialorder %v540_v42, 0.0 }
 0x10d   : > { %v952_v51 = vclamps-f32 %v689_v45, 256.0  ;;  %v968_v52 = vclamps-f32 %v705_v46, 256.0  ;;  %v626_v53 = vmul.f32 0.2, %v476_v41  ;;  %v642_v54 = vmul.f32 0.2, %v540_v42 }
 0x10e   : > { %v950_v55 = vclamps-f32 %v1236_v49, 256.0  ;;  %v966_v56 = vclamps-f32 %v1238_v50, 256.0  ;;  %v468_v57 = vadd.f32 %v1228_v24, %v467_v43  ;;  %v532_v58 = vadd.f32 %v1228_v24, %v531_v44  ;;  %v1033_v59 = vpop.f32.mrb[4].mxu0  ;;  %v1049_v60 = vpop.f32.mrb[4].mxu1 }
 0x10f   : > { %v658_v61 = vsel %vm594_vm4, %v476_v41, %v626_v53  ;;  %v674_v62 = vsel %vm610_vm5, %v540_v42, %v642_v54  ;;  %v489_v63 = vadd.f32 %v1033_v59, %v1228_v24  ;;  %v553_v0 = vadd.f32 %v1049_v60, %v1228_v24  ;;  %v480_v1 = vpop.f32.mrb[5].mxu0  ;;  %v544_v2 = vpop.f32.mrb[5].mxu1 }
 0x110   : > { %v690_v3 = vmul.f32 1.4142135, %v658_v61  ;;  %v706_v4 = vmul.f32 1.4142135, %v674_v62  ;;  %vm592_vm6 = vcmp.ge.f32.partialorder %v468_v57, 0.0  ;;  %vm608_vm7 = vcmp.ge.f32.partialorder %v532_v58, 0.0 }
 0x111   : > { %v624_v5 = vmul.f32 0.2, %v468_v57  ;;  %v640_v6 = vmul.f32 0.2, %v532_v58  ;;  %vm597_vm8 = vcmp.ge.f32.partialorder %v489_v63, 0.0  ;;  %vm613_vm9 = vcmp.ge.f32.partialorder %v553_v0, 0.0 }
 0x112   : > { %v953_v7 = vclamps-f32 %v690_v3, 256.0  ;;  %v969_v8 = vclamps-f32 %v706_v4, 256.0  ;;  %v629_v9 = vmul.f32 0.2, %v489_v63  ;;  %v645_v10 = vmul.f32 0.2, %v553_v0 }
 0x113   : > { %v656_v11 = vsel %vm592_vm6, %v468_v57, %v624_v5  ;;  %v672_v12 = vsel %vm608_vm7, %v532_v58, %v640_v6  ;;  %v481_v13 = vadd.f32 %v1228_v24, %v480_v1  ;;  %v545_v14 = vadd.f32 %v1228_v24, %v544_v2  ;;  %v1034_v15 = vpop.f32.mrb[6].mxu0  ;;  %v1050_v16 = vpop.f32.mrb[6].mxu1 }
 0x114   : > { %v784_v17 = vpack.c.bf16 %v953_v7, %v952_v51  ;;  %v792_v18 = vpack.c.bf16 %v969_v8, %v968_v52  ;;  %v688_v19 = vmul.f32 1.4142135, %v656_v11  ;;  %v704_v20 = vmul.f32 1.4142135, %v672_v12  ;;  %v483_v21 = vpop.f32.mrb[7].mxu0  ;;  %v547_v22 = vpop.f32.mrb[7].mxu1 }
 0x115   : > { %v661_v23 = vsel %vm597_vm8, %v489_v63, %v629_v9  ;;  %v677_v25 = vsel %vm613_vm9, %v553_v0, %v645_v10  ;;  %vm595_vm10 = vcmp.ge.f32.partialorder %v481_v13, 0.0  ;;  %v627_v26 = vmul.f32 0.2, %v481_v13  ;;  %v1037_v27 = vpop.f32.mrb[8].mxu0  ;;  %v1053_v28 = vpop.f32.mrb[8].mxu1 }
 0x116   : > { %800 = vst [vmem:[%s1251_s28 + $0x8] sm:$0xff] %v784_v17  ;;  %808 = vst [vmem:[%s1251_s28 + $0x48] sm:$0xff] %v792_v18  ;;  %v951_v29 = vclamps-f32 %v688_v19, 256.0  ;;  %v967_v30 = vclamps-f32 %v704_v20, 256.0  ;;  %v693_v31 = vmul.f32 1.4142135, %v661_v23  ;;  %v492_v35 = vadd.f32 %v1034_v15, %v1228_v24 }
 0x117   : > { %v1259_v32 = vmul.f32 1.4142135, %v677_v25  ;;  %v659_v33 = vsel %vm595_vm10, %v481_v13, %v627_v26  ;;  %vm611_vm11 = vcmp.ge.f32.partialorder %v545_v14, 0.0  ;;  %v643_v34 = vmul.f32 0.2, %v545_v14  ;;  %v496_v36 = vpop.f32.mrb[9].mxu0 }
 0x118   : > { %v560_v37 = vpop.f32.mrb[9].mxu1  ;;  %v783_v38 = vpack.c.bf16 %v951_v29, %v950_v55  ;;  %v791_v39 = vpack.c.bf16 %v967_v30, %v966_v56  ;;  %v956_v40 = vclamps-f32 %v693_v31, 256.0  ;;  %v1038_v42 = vpop.f32.mrb[10].mxu0  ;;  %v691_v44 = vmul.f32 1.4142135, %v659_v33 }
 0x119   : > { %v972_v41 = vclamps-f32 %v1259_v32, 256.0  ;;  %v1263_v43 = vpop.f32.mrb[10].mxu1  ;;  %v675_v45 = vsel %vm611_vm11, %v545_v14, %v643_v34  ;;  %vm598_vm12 = vcmp.ge.f32.partialorder %v492_v35, 0.0  ;;  %v630_v46 = vmul.f32 0.2, %v492_v35  ;;  %v1265_v47 = vpop.f32.mrb[11].mxu0 }
 0x11a   : > { %799 = vst [vmem:[%s1251_s28] sm:$0xff] %v783_v38  ;;  %807 = vst [vmem:[%s1251_s28 + $0x40] sm:$0xff] %v791_v39  ;;  %v707_v48 = vmul.f32 1.4142135, %v675_v45  ;;  %v556_v49 = vadd.f32 %v1050_v16, %v1228_v24  ;;  %v484_v50 = vadd.f32 %v1228_v24, %v483_v21  ;;  %v548_v51 = vadd.f32 %v1228_v24, %v547_v22  ;;  %v1272_v52 = vpop.f32.mrb[11].mxu1 }
 0x11b   : > { %v954_v53 = vclamps-f32 %v691_v44, 256.0  ;;  %v662_v54 = vsel %vm598_vm12, %v492_v35, %v630_v46  ;;  %v505_v55 = vadd.f32 %v1037_v27, %v1228_v24  ;;  %v569_v56 = vadd.f32 %v1053_v28, %v1228_v24 }
 0x11c   : > { %v970_v57 = vclamps-f32 %v707_v48, 256.0  ;;  %v694_v58 = vmul.f32 1.4142135, %v662_v54  ;;  %vm614_vm13 = vcmp.ge.f32.partialorder %v556_v49, 0.0  ;;  %v646_v59 = vmul.f32 0.2, %v556_v49 }
 0x11d   : > { %vm596_vm14 = vcmp.ge.f32.partialorder %v484_v50, 0.0  ;;  %v628_v60 = vmul.f32 0.2, %v484_v50  ;;  %vm612_vm15 = vcmp.ge.f32.partialorder %v548_v51, 0.0  ;;  %v644_v61 = vmul.f32 0.2, %v548_v51 }
 0x11e   : > { %v957_v62 = vclamps-f32 %v694_v58, 256.0  ;;  %v678_v63 = vsel %vm614_vm13, %v556_v49, %v646_v59  ;;  %vm601_vm0 = vcmp.ge.f32.partialorder %v505_v55, 0.0  ;;  %v633_v0 = vmul.f32 0.2, %v505_v55  ;;  %v1041_v1 = vpop.f32.mrb[12].mxu0  ;;  %v1057_v2 = vpop.f32.mrb[12].mxu1 }
 0x11f   : > { %v710_v3 = vmul.f32 1.4142135, %v678_v63  ;;  %v660_v4 = vsel %vm596_vm14, %v484_v50, %v628_v60  ;;  %v676_v5 = vsel %vm612_vm15, %v548_v51, %v644_v61  ;;  %vm617_vm1 = vcmp.ge.f32.partialorder %v569_v56, 0.0  ;;  %v512_v6 = vpop.f32.mrb[13].mxu0  ;;  %v1276_v7 = vpop.f32.mrb[13].mxu1 }
 0x120   : > { %v786_v8 = vpack.c.bf16 %v957_v62, %v956_v40  ;;  %v692_v9 = vmul.f32 1.4142135, %v660_v4  ;;  %v708_v10 = vmul.f32 1.4142135, %v676_v5  ;;  %v665_v11 = vsel %vm601_vm0, %v505_v55, %v633_v0  ;;  %v1278_v12 = vpop.f32.mrb[14].mxu0  ;;  %v1280_v13 = vpop.f32.mrb[14].mxu1 }
 0x121   : > { %v973_v14 = vclamps-f32 %v710_v3, 256.0  ;;  %v697_v15 = vmul.f32 1.4142135, %v665_v11  ;;  %v649_v16 = vmul.f32 0.2, %v569_v56  ;;  %v497_v17 = vadd.f32 %v1228_v24, %v496_v36  ;;  %v1283_v18 = vpop.f32.mrb[15].mxu0 }
 0x122   : > { %802 = vst [vmem:[%s1251_s28 + $0x18] sm:$0xff] %v786_v8  ;;  %v955_v19 = vclamps-f32 %v692_v9, 256.0  ;;  %v971_v20 = vclamps-f32 %v708_v10, 256.0  ;;  %v561_v21 = vadd.f32 %v1228_v24, %v560_v37  ;;  %v508_v22 = vadd.f32 %v1038_v42, %v1228_v24  ;;  %v1288_v23 = vpop.f32.mrb[15].mxu1 }
 0x123   : > { %v794_v25 = vpack.c.bf16 %v973_v14, %v972_v41  ;;  %v681_v26 = vsel %vm617_vm1, %v569_v56, %v649_v16  ;;  %vm599_vm2 = vcmp.ge.f32.partialorder %v497_v17, 0.0  ;;  %v631_v30 = vmul.f32 0.2, %v497_v17 }
 0x124   : > { %v785_v27 = vpack.c.bf16 %v955_v19, %v954_v53  ;;  %v793_v28 = vpack.c.bf16 %v971_v20, %v970_v57  ;;  %v713_v29 = vmul.f32 1.4142135, %v681_v26  ;;  %vm615_vm3 = vcmp.ge.f32.partialorder %v561_v21, 0.0 }
 0x125   : > { %810 = vst [vmem:[%s1251_s28 + $0x58] sm:$0xff] %v794_v25  ;;  %v647_v31 = vmul.f32 0.2, %v561_v21  ;;  %vm602_vm4 = vcmp.ge.f32.partialorder %v508_v22, 0.0  ;;  %v634_v32 = vmul.f32 0.2, %v508_v22  ;;  %v663_v34 = vsel %vm599_vm2, %v497_v17, %v631_v30 }
 0x126   : > { %801 = vst [vmem:[%s1251_s28 + $0x10] sm:$0xff] %v785_v27  ;;  %809 = vst [vmem:[%s1251_s28 + $0x50] sm:$0xff] %v793_v28  ;;  %v960_v33 = vclamps-f32 %v697_v15, 256.0  ;;  %v572_v35 = vadd.f32 %v1263_v43, %v1228_v24  ;;  %v500_v36 = vadd.f32 %v1228_v24, %v1265_v47  ;;  %v695_v37 = vmul.f32 1.4142135, %v663_v34 }
 0x127   : > { %v679_v38 = vsel %vm615_vm3, %v561_v21, %v647_v31  ;;  %v666_v39 = vsel %vm602_vm4, %v508_v22, %v634_v32  ;;  %v564_v40 = vadd.f32 %v1228_v24, %v1272_v52  ;;  %v976_v44 = vclamps-f32 %v713_v29, 256.0 }
 0x128   : > { %v711_v41 = vmul.f32 1.4142135, %v679_v38  ;;  %v698_v42 = vmul.f32 1.4142135, %v666_v39  ;;  %vm618_vm5 = vcmp.ge.f32.partialorder %v572_v35, 0.0  ;;  %vm600_vm6 = vcmp.ge.f32.partialorder %v500_v36, 0.0 }
 0x129   : > { %v650_v45 = vmul.f32 0.2, %v572_v35  ;;  %v632_v46 = vmul.f32 0.2, %v500_v36  ;;  %vm616_vm7 = vcmp.ge.f32.partialorder %v564_v40, 0.0  ;;  %v958_v48 = vclamps-f32 %v695_v37, 256.0 }
 0x12a   : > { %v961_v43 = vclamps-f32 %v698_v42, 256.0  ;;  %v648_v49 = vmul.f32 0.2, %v564_v40  ;;  %v521_v47 = vadd.f32 %v1041_v1, %v1228_v24  ;;  %v585_v53 = vadd.f32 %v1057_v2, %v1228_v24 }
 0x12b   : > { %v682_v50 = vsel %vm618_vm5, %v572_v35, %v650_v45  ;;  %v664_v51 = vsel %vm600_vm6, %v500_v36, %v632_v46  ;;  %v513_v52 = vadd.f32 %v1228_v24, %v512_v6  ;;  %v974_v58 = vclamps-f32 %v711_v41, 256.0 }
 0x12c   : > { %v788_v54 = vpack.c.bf16 %v961_v43, %v960_v33  ;;  %v714_v55 = vmul.f32 1.4142135, %v682_v50  ;;  %v696_v56 = vmul.f32 1.4142135, %v664_v51  ;;  %v680_v57 = vsel %vm616_vm7, %v564_v40, %v648_v49 }
 0x12d   : > { %v712_v59 = vmul.f32 1.4142135, %v680_v57  ;;  %vm605_vm8 = vcmp.ge.f32.partialorder %v521_v47, 0.0  ;;  %v637_v60 = vmul.f32 0.2, %v521_v47  ;;  %vm621_vm9 = vcmp.ge.f32.partialorder %v585_v53, 0.0 }
 0x12e   : > { %804 = vst [vmem:[%s1251_s28 + $0x28] sm:$0xff] %v788_v54  ;;  %v977_v61 = vclamps-f32 %v714_v55, 256.0  ;;  %v959_v62 = vclamps-f32 %v696_v56, 256.0  ;;  %v653_v63 = vmul.f32 0.2, %v585_v53  ;;  %vm603_vm10 = vcmp.ge.f32.partialorder %v513_v52, 0.0 }
 0x12f   : > { %v975_v0 = vclamps-f32 %v712_v59, 256.0  ;;  %v635_v1 = vmul.f32 0.2, %v513_v52  ;;  %v577_v2 = vadd.f32 %v1228_v24, %v1276_v7  ;;  %v669_v5 = vsel %vm605_vm8, %v521_v47, %v637_v60 }
 0x130   : > { %v796_v3 = vpack.c.bf16 %v977_v61, %v976_v44  ;;  %v787_v4 = vpack.c.bf16 %v959_v62, %v958_v48  ;;  %v685_v8 = vsel %vm621_vm9, %v585_v53, %v653_v63  ;;  %v524_v11 = vadd.f32 %v1278_v12, %v1228_v24 }
 0x131   : > { %v795_v6 = vpack.c.bf16 %v975_v0, %v974_v58  ;;  %vm619_vm11 = vcmp.ge.f32.partialorder %v577_v2, 0.0  ;;  %v667_v9 = vsel %vm603_vm10, %v513_v52, %v635_v1  ;;  %v651_v10 = vmul.f32 0.2, %v577_v2 }
 0x132   : > { %812 = vst [vmem:[%s1251_s28 + $0x68] sm:$0xff] %v796_v3  ;;  %803 = vst [vmem:[%s1251_s28 + $0x20] sm:$0xff] %v787_v4  ;;  %v701_v14 = vmul.f32 1.4142135, %v669_v5  ;;  %v588_v15 = vadd.f32 %v1280_v13, %v1228_v24  ;;  %v516_v7 = vadd.f32 %v1228_v24, %v1283_v18  ;;  %v580_v16 = vadd.f32 %v1228_v24, %v1288_v23 }
 0x133   : > { %811 = vst [vmem:[%s1251_s28 + $0x60] sm:$0xff] %v795_v6  ;;  %v717_v17 = vmul.f32 1.4142135, %v685_v8  ;;  %v683_v19 = vsel %vm619_vm11, %v577_v2, %v651_v10  ;;  %vm606_vm12 = vcmp.ge.f32.partialorder %v524_v11, 0.0  ;;  %v638_v20 = vmul.f32 0.2, %v524_v11 }
 0x134   : > { %v699_v21 = vmul.f32 1.4142135, %v667_v9  ;;  %vm622_vm13 = vcmp.ge.f32.partialorder %v588_v15, 0.0  ;;  %v654_v22 = vmul.f32 0.2, %v588_v15  ;;  %vm604_vm14 = vcmp.ge.f32.partialorder %v516_v7, 0.0 }
 0x135   : > { %v670_v12 = vsel %vm606_vm12, %v524_v11, %v638_v20  ;;  %v636_v25 = vmul.f32 0.2, %v516_v7  ;;  %vm620_vm15 = vcmp.ge.f32.partialorder %v580_v16, 0.0  ;;  %v652_v26 = vmul.f32 0.2, %v580_v16 }
 0x136   : > { %v715_v27 = vmul.f32 1.4142135, %v683_v19  ;;  %v702_v13 = vmul.f32 1.4142135, %v670_v12  ;;  %v686_v28 = vsel %vm622_vm13, %v588_v15, %v654_v22  ;;  %v964_v24 = vclamps-f32 %v701_v14, 256.0 }
 0x137   : > { %v718_v18 = vmul.f32 1.4142135, %v686_v28  ;;  %v668_v29 = vsel %vm604_vm14, %v516_v7, %v636_v25  ;;  %v684_v30 = vsel %vm620_vm15, %v580_v16, %v652_v26  ;;  %v980_v33 = vclamps-f32 %v717_v17, 256.0 }
 0x138   : > { %v965_v23 = vclamps-f32 %v702_v13, 256.0  ;;  %v700_v31 = vmul.f32 1.4142135, %v668_v29  ;;  %v716_v32 = vmul.f32 1.4142135, %v684_v30  ;;  %v962_v34 = vclamps-f32 %v699_v21, 256.0 }
 0x139   : > { %v981_v35 = vclamps-f32 %v718_v18, 256.0  ;;  %v978_v36 = vclamps-f32 %v715_v27, 256.0 }
 0x13a   : > { %v790_v37 = vpack.c.bf16 %v965_v23, %v964_v24  ;;  %v963_v38 = vclamps-f32 %v700_v31, 256.0  ;;  %v979_v39 = vclamps-f32 %v716_v32, 256.0 }
 0x13b   : > { %v798_v40 = vpack.c.bf16 %v981_v35, %v980_v33 }
 0x13c   : > { %806 = vst [vmem:[%s1251_s28 + $0x38] sm:$0xff] %v790_v37  ;;  %v789_v41 = vpack.c.bf16 %v963_v38, %v962_v34  ;;  %v797_v42 = vpack.c.bf16 %v979_v39, %v978_v36 }
 0x13d   : > { %814 = vst [vmem:[%s1251_s28 + $0x78] sm:$0xff] %v798_v40 }
 0x13e   : > { %805 = vst [vmem:[%s1251_s28 + $0x30] sm:$0xff] %v789_v41  ;;  %813 = vst [vmem:[%s1251_s28 + $0x70] sm:$0xff] %v797_v42 }
 0x13f PF: > { %s13_s14 = sadd.s32 1, %s1145_s14   ;;  %s1334_s12 = smov %s1141_s13 }
 0x140   : > { %p10_p5 = scmp.ge.s32.totalorder %s13_s14, 4   ;;  %s1335_s13 = smov %s1337_s15 }
 0x142   :  { %12 = sbr.rel (!%p10_p5) target bundleno = 2 (0x2), region = 65 }

</bundles_post_ra>
